<compile_context>
chip_gen: v7x
topology: tpu7x:2x2x1
jax: 0.10.0
libtpu: 0.0.40
codegen_flags: <defaults>
</compile_context>

<pallas_src>
import jax
import jax.numpy as jnp
from jax.experimental import pallas as pl
from jax.experimental.pallas import tpu as pltpu

INPUT_SIZE = 784
HIDDEN_SIZE = 600
NUM_CLASSES = 10

# Lane-aligned (multiple-of-128) padded dims.
IN_PAD = 896     # 7 * 128
HID_PAD = 640    # 5 * 128
OUT_PAD = 128    # 1 * 128


def _round_up(x, m):
    return ((x + m - 1) // m) * m


def mlp_kernel(x_ref, w1_ref, b1_ref, w2_ref, b2_ref, o_ref):
    # fc1 on the MXU: bf16 inputs, f32 accumulation.
    h = jnp.dot(x_ref[...], w1_ref[...], preferred_element_type=jnp.float32)
    # Bias + ReLU on the f32 accumulator (VPU).
    h = jnp.maximum(h + b1_ref[...], 0.0)                # [TILE_B, 640]
    # fc2: cast hidden back to bf16 for the MXU, accumulate in f32.
    out = jnp.dot(h.astype(jnp.bfloat16), w2_ref[...],
                  preferred_element_type=jnp.float32)    # [TILE_B, 128]
    o_ref[...] = (out + b2_ref[...]).astype(o_ref.dtype)


def prepare_params(w1, b1, w2, b2):
    """Pad to lane-aligned shapes and cast weights to bf16 (done once, outside
    the kernel). Zero padding is exact: padded hidden units are relu(0)=0 and
    padded output lanes are 0 + 0 bias, sliced away by the wrapper."""
    w1_p = jnp.zeros((IN_PAD, HID_PAD), jnp.float32).at[:INPUT_SIZE, :HIDDEN_SIZE].set(w1)
    b1_p = jnp.zeros((1, HID_PAD), jnp.float32).at[0, :HIDDEN_SIZE].set(b1)
    w2_p = jnp.zeros((HID_PAD, OUT_PAD), jnp.float32).at[:HIDDEN_SIZE, :NUM_CLASSES].set(w2)
    b2_p = jnp.zeros((1, OUT_PAD), jnp.float32).at[0, :NUM_CLASSES].set(b2)
    return w1_p.astype(jnp.bfloat16), b1_p, w2_p.astype(jnp.bfloat16), b2_p


def net_forward(x, w1_p, b1_p, w2_p, b2_p, *, tile_b=256):
    """x: [B, 784] f32/bf16. Returns [B, 10] f32."""
    B = x.shape[0]
    # Batch tile: 256 rows (fills v6e/v7x 256-wide MXU; 2x128 on v5e), but never
    # larger than the (8-row-aligned) batch itself for small inputs.
    tile_b = min(tile_b, _round_up(B, 8))
    b_pad = _round_up(B, tile_b)

    # Pad batch + feature dims; cast activations to bf16 (halves x DMA bytes).
    x_p = jnp.pad(x, ((0, b_pad - B), (0, IN_PAD - x.shape[1]))).astype(jnp.bfloat16)

    grid = (b_pad // tile_b,)

    bytes_accessed = (
        x_p.size * 2                      # bf16 x
        + w1_p.size * 2 + w2_p.size * 2   # bf16 weights
        + b1_p.size * 4 + b2_p.size * 4   # f32 biases
        + b_pad * OUT_PAD * 4             # f32 out
    )
    cost = pl.CostEstimate(
        flops=2 * b_pad * (IN_PAD * HID_PAD + HID_PAD * OUT_PAD),
        transcendentals=0,
        bytes_accessed=bytes_accessed,
    )

    out = pl.pallas_call(
        mlp_kernel,
        out_shape=jax.ShapeDtypeStruct((b_pad, OUT_PAD), jnp.float32),
        grid=grid,
        in_specs=[
            pl.BlockSpec((tile_b, IN_PAD), lambda i: (i, 0)),   # x streams
            pl.BlockSpec((IN_PAD, HID_PAD), lambda i: (0, 0)),  # w1 resident
            pl.BlockSpec((1, HID_PAD), lambda i: (0, 0)),       # b1 resident
            pl.BlockSpec((HID_PAD, OUT_PAD), lambda i: (0, 0)), # w2 resident
            pl.BlockSpec((1, OUT_PAD), lambda i: (0, 0)),       # b2 resident
        ],
        out_specs=pl.BlockSpec((tile_b, OUT_PAD), lambda i: (i, 0)),
        compiler_params=pltpu.CompilerParams(
            dimension_semantics=("parallel",),
        ),
        cost_estimate=cost,
    )(x_p, w1_p, b1_p, w2_p, b2_p)

    return out[:B, :NUM_CLASSES]


def init_params(key):
    # Mimics PyTorch's uniform(-1/sqrt(fan_in), +1/sqrt(fan_in)) init.
    k1, k2, k3, k4 = jax.random.split(key, 4)
    bound1 = 1.0 / jnp.sqrt(INPUT_SIZE)
    bound2 = 1.0 / jnp.sqrt(HIDDEN_SIZE)
    w1 = jax.random.uniform(k1, (INPUT_SIZE, HIDDEN_SIZE), jnp.float32, -bound1, bound1)
    b1 = jax.random.uniform(k2, (HIDDEN_SIZE,), jnp.float32, -bound1, bound1)
    w2 = jax.random.uniform(k3, (HIDDEN_SIZE, NUM_CLASSES), jnp.float32, -bound2, bound2)
    b2 = jax.random.uniform(k4, (NUM_CLASSES,), jnp.float32, -bound2, bound2)
    return w1, b1, w2, b2


if __name__ == "__main__":
    key = jax.random.PRNGKey(0)
    k_params, k_x = jax.random.split(key)
    w1, b1, w2, b2 = init_params(k_params)
    params = prepare_params(w1, b1, w2, b2)

    B = 8
    x = jax.random.normal(k_x, (B, INPUT_SIZE), jnp.float32)

    out = net_forward(x, *params)
    out = jax.block_until_ready(out)

    # Pure-JAX f32 reference of the same forward pass (bf16 kernel -> loose tol).
    ref = jnp.maximum(x @ w1 + b1[None, :], 0.0) @ w2 + b2[None, :]
    assert out.shape == (B, NUM_CLASSES)
    assert jnp.allclose(out, ref, atol=2e-2, rtol=2e-2), \
        f"max abs err {jnp.max(jnp.abs(out - ref))}"

    print("KERNEL_OK")
</pallas_src>

<mosaic_0001>
module attributes {stable_mosaic.version = 11 : i64} {
  func.func @mlp_kernel(%arg0: i32, %arg1: memref<8x896xbf16, #tpu.memory_space<vmem>>, %arg2: memref<896x640xbf16, #tpu.memory_space<vmem>>, %arg3: memref<1x640xf32, #tpu.memory_space<vmem>>, %arg4: memref<640x128xbf16, #tpu.memory_space<vmem>>, %arg5: memref<1x128xf32, #tpu.memory_space<vmem>>, %arg6: memref<8x128xf32, #tpu.memory_space<vmem>>) attributes {dimension_semantics = [#tpu.dimension_semantics<parallel>], iteration_bounds = array<i64: 1>, scalar_prefetch = 0 : i64, scratch_operands = 0 : i64, tpu.core_type = #tpu.core_type<tc>, window_params = [{transform_indices = @transform_0, window_bounds = array<i64: 8, 896>}, {pipeline_mode = #tpu.pipeline_mode<synchronous>, transform_indices = @transform_1, window_bounds = array<i64: 896, 640>}, {pipeline_mode = #tpu.pipeline_mode<synchronous>, transform_indices = @transform_2, window_bounds = array<i64: 1, 640>}, {pipeline_mode = #tpu.pipeline_mode<synchronous>, transform_indices = @transform_3, window_bounds = array<i64: 640, 128>}, {pipeline_mode = #tpu.pipeline_mode<synchronous>, transform_indices = @transform_4, window_bounds = array<i64: 1, 128>}, {transform_indices = @transform_5, window_bounds = array<i64: 8, 128>}]} {
    %c0 = arith.constant 0 : index
    %c0_0 = arith.constant 0 : index
    %0 = vector.load %arg1[%c0, %c0_0] : memref<8x896xbf16, #tpu.memory_space<vmem>>, vector<8x896xbf16>
    %c0_1 = arith.constant 0 : index
    %c0_2 = arith.constant 0 : index
    %1 = vector.load %arg2[%c0_1, %c0_2] : memref<896x640xbf16, #tpu.memory_space<vmem>>, vector<896x640xbf16>
    %cst = arith.constant dense<0.000000e+00> : vector<8x640xf32>
    %2 = tpu.matmul %0, %1, %cst {dimension_numbers = #tpu.dot_dimension_numbers<[1], [0], [0], [1], [0, 0, 1, 1], [], []>} : vector<8x896xbf16>, vector<896x640xbf16>, vector<8x640xf32> -> vector<8x640xf32>
    %c0_3 = arith.constant 0 : index
    %c0_4 = arith.constant 0 : index
    %3 = vector.load %arg3[%c0_3, %c0_4] : memref<1x640xf32, #tpu.memory_space<vmem>>, vector<1x640xf32>
    %4 = vector.broadcast %3 : vector<1x640xf32> to vector<8x640xf32>
    %5 = arith.addf %2, %4 : vector<8x640xf32>
    %cst_5 = arith.constant 0.000000e+00 : f32
    %6 = vector.broadcast %cst_5 : f32 to vector<8x640xf32>
    %7 = arith.maximumf %5, %6 : vector<8x640xf32>
    %8 = arith.truncf %7 : vector<8x640xf32> to vector<8x640xbf16>
    %c0_6 = arith.constant 0 : index
    %c0_7 = arith.constant 0 : index
    %9 = vector.load %arg4[%c0_6, %c0_7] : memref<640x128xbf16, #tpu.memory_space<vmem>>, vector<640x128xbf16>
    %cst_8 = arith.constant dense<0.000000e+00> : vector<8x128xf32>
    %10 = tpu.matmul %8, %9, %cst_8 {dimension_numbers = #tpu.dot_dimension_numbers<[1], [0], [0], [1], [0, 0, 1, 1], [], []>} : vector<8x640xbf16>, vector<640x128xbf16>, vector<8x128xf32> -> vector<8x128xf32>
    %c0_9 = arith.constant 0 : index
    %c0_10 = arith.constant 0 : index
    %11 = vector.load %arg5[%c0_9, %c0_10] : memref<1x128xf32, #tpu.memory_space<vmem>>, vector<1x128xf32>
    %12 = vector.broadcast %11 : vector<1x128xf32> to vector<8x128xf32>
    %13 = arith.addf %10, %12 : vector<8x128xf32>
    %c0_11 = arith.constant 0 : index
    %c0_12 = arith.constant 0 : index
    %14 = vector.load %arg6[%c0_11, %c0_12] : memref<8x128xf32, #tpu.memory_space<vmem>>, vector<8x128xf32>
    tpu.vector_store %arg6[%c0_11, %c0_12], %13 {strides = array<i32>} : memref<8x128xf32, #tpu.memory_space<vmem>>, vector<8x128xf32>,
    return
  }
  func.func @transform_0(%arg0: i32) -> (i32, i32) {
    %c0_i32 = arith.constant 0 : i32
    %c0_i32_0 = arith.constant 0 : i32
    return %arg0, %c0_i32 : i32, i32
  }
  func.func @transform_1(%arg0: i32) -> (i32, i32) {
    %c0_i32 = arith.constant 0 : i32
    %c0_i32_0 = arith.constant 0 : i32
    %c0_i32_1 = arith.constant 0 : i32
    return %c0_i32, %c0_i32_0 : i32, i32
  }
  func.func @transform_2(%arg0: i32) -> (i32, i32) {
    %c0_i32 = arith.constant 0 : i32
    %c0_i32_0 = arith.constant 0 : i32
    %c0_i32_1 = arith.constant 0 : i32
    return %c0_i32, %c0_i32_0 : i32, i32
  }
  func.func @transform_3(%arg0: i32) -> (i32, i32) {
    %c0_i32 = arith.constant 0 : i32
    %c0_i32_0 = arith.constant 0 : i32
    %c0_i32_1 = arith.constant 0 : i32
    return %c0_i32, %c0_i32_0 : i32, i32
  }
  func.func @transform_4(%arg0: i32) -> (i32, i32) {
    %c0_i32 = arith.constant 0 : i32
    %c0_i32_0 = arith.constant 0 : i32
    %c0_i32_1 = arith.constant 0 : i32
    return %c0_i32, %c0_i32_0 : i32, i32
  }
  func.func @transform_5(%arg0: i32) -> (i32, i32) {
    %c0_i32 = arith.constant 0 : i32
    %c0_i32_0 = arith.constant 0 : i32
    return %arg0, %c0_i32 : i32, i32
  }
}

</mosaic_0001>

<bundles_post_ra>
// kernel: tpu_custom_call.1
= control target key start
LH: loop header
LB: loop body
LE: loop exit
PB: predicated region body
PF: predicated region fallthrough
CT: control target
= control target key end

     0   :  { %10 = vsyncpa [#allocation3], 0  ;;  %s4193_s0 = inlined_call_operand.hbm [shape: bf16[8,896], index: 0, kind: input, shape index: {}]   ;;  %s4194_s1 = inlined_call_operand.hbm [shape: bf16[896,640], index: 1, kind: input, shape index: {}]   ;;  %s4195_s2 = inlined_call_operand.hbm [shape: f32[1,640], index: 2, kind: input, shape index: {}]   ;;  %s4196_s3 = inlined_call_operand.hbm [shape: bf16[640,128], index: 3, kind: input, shape index: {}]   ;;  %s4197_s4 = inlined_call_operand.hbm [shape: f32[1,128], index: 4, kind: input, shape index: {}]   ;;  %s4198_s5 = inlined_call_operand.hbm [shape: f32[8,128], index: 5, kind: output, shape index: {}]  }
   0x1   :  { %11 = vsyncpa [#allocation6], 0 }
   0x2   :  { %12 = vsyncpa [#allocation9], 0 }
   0x3   :  { %13 = vsyncpa [#allocation4], 0  ;;  %s4011_s18 = smov [#allocation5]   ;;  %s3871_s22 = scalar_lea.hbm %s4194_s1, 35840 }
   0x4   :  { %s29_s19 = sshll.u32 %s4011_s18, 4  ;;  %p3872_p0 = scmp.ne.s32.totalorder %s4194_s1, %s3871_s22  ;;  %s30_s19 = int_to_ptr.vmem [resolvable:$true] %s29_s19 }
   0x5   :  { %p3875_p1 = scmp.lt.u32.totalorder %s3871_s22, %s4194_s1 }
   0x7   :  { %p3877_p2 = pnand %p3875_p1, %p3872_p0 }
   0x9   :  { %3880 = shalt.err (!%p3877_p2)
}
   0xa   :  { %s3881_s27 = scalar_lea.vmem %s30_s19, 35840  ;;  %p3886_p4 = scmp.lt.s32.totalorder %s30_s19, %s30_s19 }
   0xb   :  { %p3882_p3 = scmp.ne.s32.totalorder %s30_s19, %s3881_s27  ;;  %p3887_p5 = scmp.lt.s32.totalorder %s3881_s27, %s3881_s27 }
   0xd   :  { %p3888_p6 = por %p3887_p5, %p3886_p4 }
   0xf   :  { %p3889_p7 = pnand %p3888_p6, %p3882_p3 }
  0x11   :  { %3892 = shalt.err (!%p3889_p7)
}
  0x12   :  { %s4012_s28 = smov 320   ;;  %s4013_s29 = smov 20  }
  0x13   :  { %35 = dma.hbm_to_vmem [thread:$0]  %s4194_s1, 35840, %s30_s19, [#allocation6], %s4012_s28, %s4012_s28, %s4013_s29  }
  0x14   :  { %s4014_s7 = smov [#allocation8]   ;;  %s3893_s11 = scalar_lea.hbm %s4196_s3, 5120 }
  0x15   :  { %s51_s8 = sshll.u32 %s4014_s7, 4  ;;  %p3894_p8 = scmp.ne.s32.totalorder %s4196_s3, %s3893_s11  ;;  %s52_s8 = int_to_ptr.vmem [resolvable:$true] %s51_s8 }
  0x16   :  { %p3897_p9 = scmp.lt.u32.totalorder %s3893_s11, %s4196_s3 }
  0x18   :  { %p3899_p10 = pnand %p3897_p9, %p3894_p8 }
  0x1a   :  { %3902 = shalt.err (!%p3899_p10)
}
  0x1b   :  { %s3903_s16 = scalar_lea.vmem %s52_s8, 5120  ;;  %p3908_p12 = scmp.lt.s32.totalorder %s52_s8, %s52_s8 }
  0x1c   :  { %p3904_p11 = scmp.ne.s32.totalorder %s52_s8, %s3903_s16  ;;  %p3909_p13 = scmp.lt.s32.totalorder %s3903_s16, %s3903_s16 }
  0x1e   :  { %p3910_p0 = por %p3909_p13, %p3908_p12 }
  0x20   :  { %p3911_p1 = pnand %p3910_p0, %p3904_p11 }
  0x22   :  { %3914 = shalt.err (!%p3911_p1)
}
  0x23   :  { %s4015_s1 = smov 64   ;;  %s4016_s17 = smov 4  }
  0x24   :  { %57 = dma.hbm_to_vmem [thread:$0]  %s4196_s3, 5120, %s52_s8, [#allocation9], %s4015_s1, %s4015_s1, %s4016_s17  }
  0x25   :  { %s4017_s20 = smov [#allocation2]   ;;  %s4018_s22 = smov [#allocation7]  }
  0x26   :  { %s20_s21 = sshll.u32 %s4017_s20, 4  ;;  %s42_s23 = sshll.u32 %s4018_s22, 4  ;;  %s21_s21 = int_to_ptr.vmem [resolvable:$true] %s20_s21  ;;  %s43_s23 = int_to_ptr.vmem [resolvable:$true] %s42_s23 }
  0x27   :  { %s3915_s26 = scalar_lea.hbm %s4193_s0, 448 }
  0x28   :  { %p3916_p2 = scmp.ne.s32.totalorder %s4193_s0, %s3915_s26  ;;  %p3919_p3 = scmp.lt.u32.totalorder %s3915_s26, %s4193_s0 }
  0x2a   :  { %p3921_p4 = pnand %p3919_p3, %p3916_p2 }
  0x2c   :  { %3924 = shalt.err (!%p3921_p4)
}
  0x2d   :  { %s3925_s3 = scalar_lea.vmem %s21_s21, 448  ;;  %p3930_p6 = scmp.lt.s32.totalorder %s21_s21, %s21_s21 }
  0x2e   :  { %p3926_p5 = scmp.ne.s32.totalorder %s21_s21, %s3925_s3  ;;  %p3931_p7 = scmp.lt.s32.totalorder %s3925_s3, %s3925_s3 }
  0x30   :  { %p3932_p8 = por %p3931_p7, %p3930_p6 }
  0x32   :  { %p3933_p9 = pnand %p3932_p8, %p3926_p5 }
  0x34   :  { %3936 = shalt.err (!%p3933_p9)
}
  0x35   :  { %23 = dma.hbm_to_vmem [thread:$0]  %s4193_s0, 448, %s21_s21, [#allocation3]  }
  0x36   :  { %s3937_s10 = scalar_lea.hbm %s4195_s2, 80 }
  0x37   :  { %p3938_p10 = scmp.ne.s32.totalorder %s4195_s2, %s3937_s10  ;;  %p3941_p11 = scmp.lt.u32.totalorder %s3937_s10, %s4195_s2 }
  0x39   :  { %p3943_p12 = pnand %p3941_p11, %p3938_p10 }
  0x3b   :  { %3946 = shalt.err (!%p3943_p12)
}
  0x3c   :  { %s3947_s15 = scalar_lea.vmem %s43_s23, 80  ;;  %s3951_s16 = scalar_lea.vmem %s43_s23, 96 }
  0x3d   :  { %p3948_p13 = scmp.ne.s32.totalorder %s43_s23, %s3947_s15  ;;  %p3952_p0 = scmp.lt.s32.totalorder %s43_s23, %s43_s23 }
  0x3e   :  { %p3953_p1 = scmp.lt.s32.totalorder %s3951_s16, %s3947_s15 }
  0x40   :  { %p3954_p2 = por %p3953_p1, %p3952_p0 }
  0x42   :  { %p3955_p3 = pnand %p3954_p2, %p3948_p13 }
  0x44   :  { %3958 = shalt.err (!%p3955_p3)
}
  0x45   :  { %45 = dma.hbm_to_vmem [thread:$0]  %s4195_s2, 80, %s43_s23, [#allocation6]  }
  0x46   :  { %s4019_s17 = smov [#allocation10]   ;;  %s3959_s21 = scalar_lea.hbm %s4197_s4, 16 }
  0x47   :  { %s64_s18 = sshll.u32 %s4019_s17, 4  ;;  %p3960_p4 = scmp.ne.s32.totalorder %s4197_s4, %s3959_s21  ;;  %s65_s18 = int_to_ptr.vmem [resolvable:$true] %s64_s18 }
  0x48   :  { %p3963_p5 = scmp.lt.u32.totalorder %s3959_s21, %s4197_s4 }
  0x4a   :  { %p3965_p6 = pnand %p3963_p5, %p3960_p4 }
  0x4c   :  { %3968 = shalt.err (!%p3965_p6)
}
  0x4d   :  { %s3969_s27 = scalar_lea.vmem %s65_s18, 16  ;;  %s3973_s2 = scalar_lea.vmem %s65_s18, 32 }
  0x4e   :  { %p3970_p7 = scmp.ne.s32.totalorder %s65_s18, %s3969_s27  ;;  %p3974_p8 = scmp.lt.s32.totalorder %s65_s18, %s65_s18 }
  0x4f   :  { %p3975_p9 = scmp.lt.s32.totalorder %s3973_s2, %s3969_s27 }
  0x51   :  { %p3976_p10 = por %p3975_p9, %p3974_p8 }
  0x53   :  { %p3977_p11 = pnand %p3976_p10, %p3970_p7 }
  0x55   :  { %3980 = shalt.err (!%p3977_p11)
}
  0x56   :  { %67 = dma.hbm_to_vmem [thread:$0]  %s4197_s4, 16, %s65_s18, [#allocation9]  }
  0x57   :  { %4003 = dma.done.wait [#allocation3], 448  }
  0x58   :  { %4004 = vsyncadd [#allocation3], 4294966848 }
  0x59   :  { %4005 = dma.done.wait [#allocation6], 35920  }
  0x5a   :  { %4006 = vsyncadd [#allocation6], 4294931376 }
  0x5b   :  { %4007 = dma.done.wait [#allocation9], 5136  }
  0x5c   :  { %4008 = vsyncadd [#allocation9], 4294962160  ;;  %v3432_v0 = vld [vmem:[#allocation5 + $0x4] ss:$20 sps:$4 sm:$0xff]   ;;  %v3434_v1 = vld [vmem:[#allocation5 + $0xc] ss:$20 sps:$4 sm:$0xff]  }
  0x5d   :  { %1932 = vmatprep.subr.bf16.mxu0 %v3432_v0  ;;  %v3436_v2 = vld [vmem:[#allocation5] ss:$20 sps:$4 sm:$0xff]   ;;  %v3437_v3 = vld [vmem:[#allocation5 + $0x8] ss:$20 sps:$4 sm:$0xff]   ;;  %2096 = vmatprep.subr.bf16.mxu1 %v3434_v1  ;;  %v3443_v7 = vld [vmem:[#allocation5 + $0x30] ss:$20 sps:$4 sm:$0xff]  }
  0x5e   :  { %v3438_v4 = vld [vmem:[#allocation5 + $0x2c] ss:$20 sps:$4 sm:$0xff]   ;;  %1933 = vmatpush1.bf16.msra.mxu0 %v3436_v2  ;;  %2097 = vmatpush1.bf16.msra.mxu1 %v3437_v3  ;;  %v3440_v5 = vld [vmem:[#allocation5 + $0x34] ss:$20 sps:$4 sm:$0xff]   ;;  %v3446_v9 = vld [vmem:[#allocation5 + $0x5c] ss:$20 sps:$4 sm:$0xff]  }
  0x5f   :  { %v3442_v6 = vld [vmem:[#allocation5 + $0x28] ss:$20 sps:$4 sm:$0xff]   ;;  %1934 = vmatprep.subr.bf16.mxu0 %v3438_v4  ;;  %2098 = vmatprep.subr.bf16.mxu1 %v3440_v5  ;;  %v3448_v10 = vld [vmem:[#allocation5 + $0x50] ss:$20 sps:$4 sm:$0xff]   ;;  %v3449_v11 = vld [vmem:[#allocation5 + $0x58] ss:$20 sps:$4 sm:$0xff]  }
  0x60   :  { %v3444_v8 = vld [vmem:[#allocation5 + $0x54] ss:$20 sps:$4 sm:$0xff]   ;;  %v3450_v12 = vld [vmem:[#allocation5 + $0x7c] ss:$20 sps:$4 sm:$0xff]   ;;  %v3452_v13 = vld [vmem:[#allocation5 + $0x84] ss:$20 sps:$4 sm:$0xff]  }
  0x61   :  { %v3454_v14 = vld [vmem:[#allocation5 + $0x78] ss:$20 sps:$4 sm:$0xff]   ;;  %v3455_v15 = vld [vmem:[#allocation5 + $0x80] ss:$20 sps:$4 sm:$0xff]   ;;  %v3461_v19 = vld [vmem:[#allocation5 + $0xa8] ss:$20 sps:$4 sm:$0xff]  }
  0x62   :  { %1935 = vmatpush1.bf16.msra.mxu0 %v3442_v6  ;;  %2099 = vmatpush1.bf16.msra.mxu1 %v3443_v7  ;;  %v3456_v16 = vld [vmem:[#allocation5 + $0xa4] ss:$20 sps:$4 sm:$0xff]   ;;  %v3458_v17 = vld [vmem:[#allocation5 + $0xac] ss:$20 sps:$4 sm:$0xff]   ;;  %v3464_v21 = vld [vmem:[#allocation5 + $0xd4] ss:$20 sps:$4 sm:$0xff]  }
  0x63   :  { %1936 = vmatprep.subr.bf16.mxu0 %v3444_v8  ;;  %2100 = vmatprep.subr.bf16.mxu1 %v3446_v9  ;;  %v3460_v18 = vld [vmem:[#allocation5 + $0xa0] ss:$20 sps:$4 sm:$0xff]   ;;  %v3466_v22 = vld [vmem:[#allocation5 + $0xc8] ss:$20 sps:$4 sm:$0xff]   ;;  %v3467_v23 = vld [vmem:[#allocation5 + $0xd0] ss:$20 sps:$4 sm:$0xff]  }
  0x64   :  { %v3462_v20 = vld [vmem:[#allocation5 + $0xcc] ss:$20 sps:$4 sm:$0xff]   ;;  %v3468_v24 = vld [vmem:[#allocation5 + $0xf4] ss:$20 sps:$4 sm:$0xff]   ;;  %v3470_v25 = vld [vmem:[#allocation5 + $0xfc] ss:$20 sps:$4 sm:$0xff]  }
  0x65   :  { %v3472_v26 = vld [vmem:[#allocation5 + $0xf0] ss:$20 sps:$4 sm:$0xff]   ;;  %v3473_v27 = vld [vmem:[#allocation5 + $0xf8] ss:$20 sps:$4 sm:$0xff]   ;;  %v3479_v31 = vld [vmem:[#allocation5 + $0x120] ss:$20 sps:$4 sm:$0xff]  }
  0x66   :  { %1937 = vmatpush1.bf16.msra.mxu0 %v3448_v10  ;;  %2101 = vmatpush1.bf16.msra.mxu1 %v3449_v11  ;;  %v3474_v28 = vld [vmem:[#allocation5 + $0x11c] ss:$20 sps:$4 sm:$0xff]   ;;  %v3476_v29 = vld [vmem:[#allocation5 + $0x124] ss:$20 sps:$4 sm:$0xff]   ;;  %v3482_v33 = vld [vmem:[#allocation5 + $0x14c] ss:$20 sps:$4 sm:$0xff]  }
  0x67   :  { %1938 = vmatprep.subr.bf16.mxu0 %v3450_v12  ;;  %2102 = vmatprep.subr.bf16.mxu1 %v3452_v13  ;;  %v3478_v30 = vld [vmem:[#allocation5 + $0x118] ss:$20 sps:$4 sm:$0xff]   ;;  %v3484_v34 = vld [vmem:[#allocation5 + $0x140] ss:$20 sps:$4 sm:$0xff]   ;;  %v3485_v35 = vld [vmem:[#allocation5 + $0x148] ss:$20 sps:$4 sm:$0xff]  }
  0x68   :  { %v3480_v32 = vld [vmem:[#allocation5 + $0x144] ss:$20 sps:$4 sm:$0xff]   ;;  %v3486_v36 = vld [vmem:[#allocation5 + $0x16c] ss:$20 sps:$4 sm:$0xff]   ;;  %v3488_v37 = vld [vmem:[#allocation5 + $0x174] ss:$20 sps:$4 sm:$0xff]  }
  0x69   :  { %v3490_v38 = vld [vmem:[#allocation5 + $0x168] ss:$20 sps:$4 sm:$0xff]   ;;  %v3491_v39 = vld [vmem:[#allocation5 + $0x170] ss:$20 sps:$4 sm:$0xff]   ;;  %v3497_v43 = vld [vmem:[#allocation5 + $0x198] ss:$20 sps:$4 sm:$0xff]  }
  0x6a   :  { %1939 = vmatpush1.bf16.msra.mxu0 %v3454_v14  ;;  %2103 = vmatpush1.bf16.msra.mxu1 %v3455_v15  ;;  %v3492_v40 = vld [vmem:[#allocation5 + $0x194] ss:$20 sps:$4 sm:$0xff]   ;;  %v3494_v41 = vld [vmem:[#allocation5 + $0x19c] ss:$20 sps:$4 sm:$0xff]   ;;  %v3500_v45 = vld [vmem:[#allocation5 + $0x1c4] ss:$20 sps:$4 sm:$0xff]  }
  0x6b   :  { %1940 = vmatprep.subr.bf16.mxu0 %v3456_v16  ;;  %2104 = vmatprep.subr.bf16.mxu1 %v3458_v17  ;;  %v3496_v42 = vld [vmem:[#allocation5 + $0x190] ss:$20 sps:$4 sm:$0xff]   ;;  %v3502_v47 = vld [vmem:[#allocation5 + $0x1b8] ss:$20 sps:$4 sm:$0xff]   ;;  %v3503_v49 = vld [vmem:[#allocation5 + $0x1c0] ss:$20 sps:$4 sm:$0xff]  }
  0x6c   :  { %v3498_v44 = vld [vmem:[#allocation5 + $0x1bc] ss:$20 sps:$4 sm:$0xff]   ;;  %v84_v46 = vld [vmem:[#allocation2] sm:$0xff]  ;;  %v3506_v51 = vld [vmem:[#allocation5 + $0x1ec] ss:$20 sps:$4 sm:$0xff]   ;;  %vm4022_vm0 = vmmov 0  }
  0x6d   :  { %v4114_v48 = vcombine.high %v84_v46, %v84_v46  ;;  %v3504_v50 = vld [vmem:[#allocation5 + $0x1e4] ss:$20 sps:$4 sm:$0xff]   ;;  %v3508_v52 = vld [vmem:[#allocation5 + $0x1e0] ss:$20 sps:$4 sm:$0xff]   ;;  %v3509_v53 = vld [vmem:[#allocation5 + $0x1e8] ss:$20 sps:$4 sm:$0xff]   ;;  %v4118_v5 = vcombine.low %v84_v46, %v84_v46 }
  0x6e   :  { %1941 = vmatpush1.bf16.msra.mxu0 %v3460_v18  ;;  %2105 = vmatpush1.bf16.msra.mxu1 %v3461_v19  ;;  %v3510_v54 = vld [vmem:[#allocation5 + $0x20c] ss:$20 sps:$4 sm:$0xff]   ;;  %v3512_v55 = vld [vmem:[#allocation5 + $0x214] ss:$20 sps:$4 sm:$0xff]   ;;  %v3515_v57 = vld [vmem:[#allocation5 + $0x210] ss:$20 sps:$4 sm:$0xff]  }
  0x6f   :  { %1942 = vmatprep.subr.bf16.mxu0 %v3462_v20  ;;  %2106 = vmatprep.subr.bf16.mxu1 %v3464_v21  ;;  %v3514_v56 = vld [vmem:[#allocation5 + $0x208] ss:$20 sps:$4 sm:$0xff]   ;;  %v3520_v60 = vld [vmem:[#allocation5 + $0x230] ss:$20 sps:$4 sm:$0xff]   ;;  %v3521_v61 = vld [vmem:[#allocation5 + $0x238] ss:$20 sps:$4 sm:$0xff]  }
  0x70   :  { %1964 = vmatprep.mubr.bf16.mxu0 %v4114_v48  ;;  %2128 = vmatprep.mubr.bf16.mxu1 %v4114_v48  ;;  %v3516_v58 = vld [vmem:[#allocation5 + $0x234] ss:$20 sps:$4 sm:$0xff]   ;;  %v3518_v59 = vld [vmem:[#allocation5 + $0x23c] ss:$20 sps:$4 sm:$0xff]   ;;  %v3524_v63 = vld [vmem:[#allocation5 + $0x264] ss:$20 sps:$4 sm:$0xff]  }
  0x71   :  { %v3522_v62 = vld [vmem:[#allocation5 + $0x25c] ss:$20 sps:$4 sm:$0xff]   ;;  %v3526_v0 = vld [vmem:[#allocation5 + $0x258] ss:$20 sps:$4 sm:$0xff]   ;;  %v3527_v1 = vld [vmem:[#allocation5 + $0x260] ss:$20 sps:$4 sm:$0xff]  }
  0x72   :  { %1943 = vmatpush1.bf16.msra.mxu0 %v3466_v22  ;;  %2107 = vmatpush1.bf16.msra.mxu1 %v3467_v23  ;;  %v3531_v2 = vld [vmem:[#allocation5 + $0x284] ss:$20 sps:$4 sm:$0xff]   ;;  %v3534_v3 = vld [vmem:[#allocation5 + $0x28c] ss:$20 sps:$4 sm:$0xff]   ;;  %v3532_v6 = vld [vmem:[#allocation5 + $0x288] ss:$20 sps:$4 sm:$0xff]  }
  0x73   :  { %1944 = vmatprep.subr.bf16.mxu0 %v3468_v24  ;;  %2108 = vmatprep.subr.bf16.mxu1 %v3470_v25  ;;  %v3529_v4 = vld [vmem:[#allocation5 + $0x280] ss:$20 sps:$4 sm:$0xff]   ;;  %v3536_v9 = vld [vmem:[#allocation5 + $0x2a8] ss:$20 sps:$4 sm:$0xff]   ;;  %v3539_v10 = vld [vmem:[#allocation5 + $0x2b0] ss:$20 sps:$4 sm:$0xff]  }
  0x74   :  { %v3538_v7 = vld [vmem:[#allocation5 + $0x2ac] ss:$20 sps:$4 sm:$0xff]   ;;  %v3541_v8 = vld [vmem:[#allocation5 + $0x2b4] ss:$20 sps:$4 sm:$0xff]   ;;  %v3547_v12 = vld [vmem:[#allocation5 + $0x2dc] ss:$20 sps:$4 sm:$0xff]  }
  0x75   :  { %v3544_v11 = vld [vmem:[#allocation5 + $0x2d4] ss:$20 sps:$4 sm:$0xff]   ;;  %v3542_v13 = vld [vmem:[#allocation5 + $0x2d0] ss:$20 sps:$4 sm:$0xff]   ;;  %v3545_v14 = vld [vmem:[#allocation5 + $0x2d8] ss:$20 sps:$4 sm:$0xff]  }
  0x76   :  { %1945 = vmatpush1.bf16.msra.mxu0 %v3472_v26  ;;  %2109 = vmatpush1.bf16.msra.mxu1 %v3473_v27  ;;  %v3550_v15 = vld [vmem:[#allocation5 + $0x2fc] ss:$20 sps:$4 sm:$0xff]   ;;  %v3553_v16 = vld [vmem:[#allocation5 + $0x304] ss:$20 sps:$4 sm:$0xff]   ;;  %v3551_v18 = vld [vmem:[#allocation5 + $0x300] ss:$20 sps:$4 sm:$0xff]  }
  0x77   :  { %1946 = vmatprep.subr.bf16.mxu0 %v3474_v28  ;;  %2110 = vmatprep.subr.bf16.mxu1 %v3476_v29  ;;  %v3548_v17 = vld [vmem:[#allocation5 + $0x2f8] ss:$20 sps:$4 sm:$0xff]   ;;  %v3554_v21 = vld [vmem:[#allocation5 + $0x320] ss:$20 sps:$4 sm:$0xff]   ;;  %v3557_v22 = vld [vmem:[#allocation5 + $0x328] ss:$20 sps:$4 sm:$0xff]  }
  0x78   :  { %v3556_v19 = vld [vmem:[#allocation5 + $0x324] ss:$20 sps:$4 sm:$0xff]   ;;  %v3559_v20 = vld [vmem:[#allocation5 + $0x32c] ss:$20 sps:$4 sm:$0xff]   ;;  %v3565_v24 = vld [vmem:[#allocation5 + $0x354] ss:$20 sps:$4 sm:$0xff]  }
  0x79   :  { %v3562_v23 = vld [vmem:[#allocation5 + $0x34c] ss:$20 sps:$4 sm:$0xff]   ;;  %v3560_v25 = vld [vmem:[#allocation5 + $0x348] ss:$20 sps:$4 sm:$0xff]   ;;  %v3563_v26 = vld [vmem:[#allocation5 + $0x350] ss:$20 sps:$4 sm:$0xff]  }
  0x7a   :  { %1947 = vmatpush1.bf16.msra.mxu0 %v3478_v30  ;;  %2111 = vmatpush1.bf16.msra.mxu1 %v3479_v31  ;;  %v3568_v27 = vld [vmem:[#allocation5 + $0x374] ss:$20 sps:$4 sm:$0xff]   ;;  %v3571_v28 = vld [vmem:[#allocation5 + $0x37c] ss:$20 sps:$4 sm:$0xff]   ;;  %s4023_s4 = smov [#allocation11]  }
  0x7b   :  { %1948 = vmatprep.subr.bf16.mxu0 %v3480_v32  ;;  %2112 = vmatprep.subr.bf16.mxu1 %v3482_v33  ;;  %v4122_v29 = vld [vmem:[#allocation2 + $0x8] sm:$0xff]  ;;  %s2884_s29 = sshll.u32 %s4023_s4, 4  ;;  %s2885_s29 = int_to_ptr.vmem [resolvable:$true] %s2884_s29 }
  0x7c   :  { %v4126_v30 = vcombine.high %v4122_v29, %v4122_v29  ;;  %v3566_v31 = vld [vmem:[#allocation5 + $0x370] ss:$20 sps:$4 sm:$0xff]   ;;  %v3569_v32 = vld [vmem:[#allocation5 + $0x378] ss:$20 sps:$4 sm:$0xff]   ;;  %s3981_s30 = scalar_lea.vmem %s2885_s29, 128  ;;  %p3986_p13 = scmp.lt.s32.totalorder %s2885_s29, %s2885_s29 }
  0x7d   :  { %v3574_v33 = vld [vmem:[#allocation5 + $0x39c] ss:$20 sps:$4 sm:$0xff]   ;;  %p3982_p12 = scmp.ne.s32.totalorder %s2885_s29, %s3981_s30  ;;  %p3987_p0 = scmp.lt.s32.totalorder %s3981_s30, %s3981_s30 }
  0x7e   :  { %1949 = vmatpush1.bf16.msra.mxu0 %v3484_v34  ;;  %2113 = vmatpush1.bf16.msra.mxu1 %v3485_v35  ;;  %v3577_v34 = vld [vmem:[#allocation5 + $0x3a4] ss:$20 sps:$4 sm:$0xff]   ;;  %v3595_v46 = vld [vmem:[#allocation5 + $0x41c] ss:$20 sps:$4 sm:$0xff]  }
  0x7f   :  { %1950 = vmatprep.subr.bf16.mxu0 %v3486_v36  ;;  %2114 = vmatprep.subr.bf16.mxu1 %v3488_v37  ;;  %v3572_v35 = vld [vmem:[#allocation5 + $0x398] ss:$20 sps:$4 sm:$0xff]   ;;  %v3575_v36 = vld [vmem:[#allocation5 + $0x3a0] ss:$20 sps:$4 sm:$0xff]   ;;  %p3988_p1 = por %p3987_p0, %p3986_p13 }
  0x80   :  { %v3580_v37 = vld [vmem:[#allocation5 + $0x3c4] ss:$20 sps:$4 sm:$0xff]  }
  0x81   :  { %p3989_p2 = pnand %p3988_p1, %p3982_p12 }
  0x82   :  { %1951 = vmatpush1.bf16.msra.mxu0 %v3490_v38  ;;  %2115 = vmatpush1.bf16.msra.mxu1 %v3491_v39  ;;  %v3583_v38 = vld [vmem:[#allocation5 + $0x3cc] ss:$20 sps:$4 sm:$0xff]  }
  0x83   :  { %1952 = vmatprep.subr.bf16.mxu0 %v3492_v40  ;;  %2116 = vmatprep.subr.bf16.mxu1 %v3494_v41  ;;  %v3578_v39 = vld [vmem:[#allocation5 + $0x3c0] ss:$20 sps:$4 sm:$0xff]   ;;  %v3581_v40 = vld [vmem:[#allocation5 + $0x3c8] ss:$20 sps:$4 sm:$0xff]  }
  0x84   :  { %v3586_v41 = vld [vmem:[#allocation5 + $0x3ec] ss:$20 sps:$4 sm:$0xff]  }
  0x86   :  { %1953 = vmatpush1.bf16.msra.mxu0 %v3496_v42  ;;  %2117 = vmatpush1.bf16.msra.mxu1 %v3497_v43  ;;  %v3589_v42 = vld [vmem:[#allocation5 + $0x3f4] ss:$20 sps:$4 sm:$0xff]  }
  0x87   :  { %1954 = vmatprep.subr.bf16.mxu0 %v3498_v44  ;;  %2118 = vmatprep.subr.bf16.mxu1 %v3500_v45  ;;  %v3584_v43 = vld [vmem:[#allocation5 + $0x3e8] ss:$20 sps:$4 sm:$0xff]   ;;  %v3587_v44 = vld [vmem:[#allocation5 + $0x3f0] ss:$20 sps:$4 sm:$0xff]  }
  0x88   :  { %v3592_v45 = vld [vmem:[#allocation5 + $0x414] ss:$20 sps:$4 sm:$0xff]  }
  0x8a   :  { %1955 = vmatpush1.bf16.msra.mxu0 %v3502_v47  ;;  %2119 = vmatpush1.bf16.msra.mxu1 %v3503_v49  ;;  %v3590_v47 = vld [vmem:[#allocation5 + $0x410] ss:$20 sps:$4 sm:$0xff]   ;;  %v3593_v49 = vld [vmem:[#allocation5 + $0x418] ss:$20 sps:$4 sm:$0xff]  }
  0x8b   :  { %1956 = vmatprep.subr.bf16.mxu0 %v3504_v50  ;;  %2120 = vmatprep.subr.bf16.mxu1 %v3506_v51  ;;  %v3598_v50 = vld [vmem:[#allocation5 + $0x43c] ss:$20 sps:$4 sm:$0xff]   ;;  %v3601_v51 = vld [vmem:[#allocation5 + $0x444] ss:$20 sps:$4 sm:$0xff]  }
  0x8e   :  { %1957 = vmatpush1.bf16.msra.mxu0 %v3508_v52  ;;  %2121 = vmatpush1.bf16.msra.mxu1 %v3509_v53  ;;  %v3596_v52 = vld [vmem:[#allocation5 + $0x438] ss:$20 sps:$4 sm:$0xff]   ;;  %v3599_v53 = vld [vmem:[#allocation5 + $0x440] ss:$20 sps:$4 sm:$0xff]  }
  0x8f   :  { %1958 = vmatprep.subr.bf16.mxu0 %v3510_v54  ;;  %2122 = vmatprep.subr.bf16.mxu1 %v3512_v55  ;;  %v3604_v54 = vld [vmem:[#allocation5 + $0x464] ss:$20 sps:$4 sm:$0xff]   ;;  %v3607_v55 = vld [vmem:[#allocation5 + $0x46c] ss:$20 sps:$4 sm:$0xff]  }
  0x92   :  { %1959 = vmatpush1.bf16.msra.mxu0 %v3514_v56  ;;  %2123 = vmatpush1.bf16.msra.mxu1 %v3515_v57  ;;  %v3602_v56 = vld [vmem:[#allocation5 + $0x460] ss:$20 sps:$4 sm:$0xff]   ;;  %v3605_v57 = vld [vmem:[#allocation5 + $0x468] ss:$20 sps:$4 sm:$0xff]  }
  0x93   :  { %1960 = vmatprep.subr.bf16.mxu0 %v3516_v58  ;;  %2124 = vmatprep.subr.bf16.mxu1 %v3518_v59  ;;  %v3610_v58 = vld [vmem:[#allocation5 + $0x48c] ss:$20 sps:$4 sm:$0xff]   ;;  %v3613_v59 = vld [vmem:[#allocation5 + $0x494] ss:$20 sps:$4 sm:$0xff]  }
  0x96   :  { %1961 = vmatpush1.bf16.msra.mxu0 %v3520_v60  ;;  %2125 = vmatpush1.bf16.msra.mxu1 %v3521_v61  ;;  %v3608_v60 = vld [vmem:[#allocation5 + $0x488] ss:$20 sps:$4 sm:$0xff]   ;;  %v3611_v61 = vld [vmem:[#allocation5 + $0x490] ss:$20 sps:$4 sm:$0xff]  }
  0x97   :  { %1962 = vmatprep.subr.bf16.mxu0 %v3522_v62  ;;  %2126 = vmatprep.subr.bf16.mxu1 %v3524_v63  ;;  %v3616_v62 = vld [vmem:[#allocation5 + $0x4b4] ss:$20 sps:$4 sm:$0xff]   ;;  %v3619_v63 = vld [vmem:[#allocation5 + $0x4bc] ss:$20 sps:$4 sm:$0xff]  }
  0x9a   :  { %1963 = vmatpush1.bf16.msra.mxu0 %v3526_v0  ;;  %2127 = vmatpush1.bf16.msra.mxu1 %v3527_v1  ;;  %v3614_v0 = vld [vmem:[#allocation5 + $0x4b0] ss:$20 sps:$4 sm:$0xff]   ;;  %v3617_v1 = vld [vmem:[#allocation5 + $0x4b8] ss:$20 sps:$4 sm:$0xff]  }
  0x9b   :  { %1973 = vmatprep.subr.bf16.mxu0 %v3531_v2  ;;  %2137 = vmatprep.subr.bf16.mxu1 %v3534_v3  ;;  %v3622_v2 = vld [vmem:[#allocation5 + $0x4dc] ss:$20 sps:$4 sm:$0xff]   ;;  %v3625_v3 = vld [vmem:[#allocation5 + $0x4e4] ss:$20 sps:$4 sm:$0xff]  }
  0x9d   :  { %1965 = vmatmul.mubr.bf16.vlgmr.msra.gmra.mrb[0].mxu0 %v4118_v5  ;;  %2129 = vmatmul.mubr.bf16.vlgmr.msra.gmra.mrb[0].mxu1 %v4118_v5 }
  0x9e   :  { %1974 = vmatpush1.bf16.msra.mxu0 %v3529_v4  ;;  %2138 = vmatpush1.bf16.msra.mxu1 %v3532_v6  ;;  %v3620_v4 = vld [vmem:[#allocation5 + $0x4d8] ss:$20 sps:$4 sm:$0xff]   ;;  %v3623_v6 = vld [vmem:[#allocation5 + $0x4e0] ss:$20 sps:$4 sm:$0xff]  }
  0x9f   :  { %1975 = vmatprep.subr.bf16.mxu0 %v3538_v7  ;;  %2139 = vmatprep.subr.bf16.mxu1 %v3541_v8  ;;  %v3630_v7 = vld [vmem:[#allocation5 + $0x504] ss:$20 sps:$4 sm:$0xff]   ;;  %v3633_v8 = vld [vmem:[#allocation5 + $0x50c] ss:$20 sps:$4 sm:$0xff]  }
  0xa0   :  { %2005 = vmatprep.mubr.bf16.mxu0 %v4126_v30  ;;  %2169 = vmatprep.mubr.bf16.mxu1 %v4126_v30 }
  0xa2   :  { %1976 = vmatpush1.bf16.msra.mxu0 %v3536_v9  ;;  %2140 = vmatpush1.bf16.msra.mxu1 %v3539_v10  ;;  %v4132_v9 = vcombine.low %v4122_v29, %v4122_v29  ;;  %v3628_v10 = vld [vmem:[#allocation5 + $0x500] ss:$20 sps:$4 sm:$0xff]   ;;  %v3655_v29 = vld [vmem:[#allocation5 + $0x5a8] ss:$20 sps:$4 sm:$0xff]  }
  0xa3   :  { %1977 = vmatprep.subr.bf16.mxu0 %v3544_v11  ;;  %2141 = vmatprep.subr.bf16.mxu1 %v3547_v12  ;;  %v3631_v11 = vld [vmem:[#allocation5 + $0x508] ss:$20 sps:$4 sm:$0xff]   ;;  %v3636_v12 = vld [vmem:[#allocation5 + $0x52c] ss:$20 sps:$4 sm:$0xff]  }
  0xa6   :  { %1978 = vmatpush1.bf16.msra.mxu0 %v3542_v13  ;;  %2142 = vmatpush1.bf16.msra.mxu1 %v3545_v14  ;;  %v4134_v13 = vld [vmem:[#allocation2 + $0x10] sm:$0xff] }
  0xa7   :  { %1979 = vmatprep.subr.bf16.mxu0 %v3550_v15  ;;  %2143 = vmatprep.subr.bf16.mxu1 %v3553_v16  ;;  %v3639_v14 = vld [vmem:[#allocation5 + $0x534] ss:$20 sps:$4 sm:$0xff]   ;;  %v4138_v15 = vcombine.high %v4134_v13, %v4134_v13 }
  0xa8   :  { %v3634_v16 = vld [vmem:[#allocation5 + $0x528] ss:$20 sps:$4 sm:$0xff]  }
  0xaa   :  { %1980 = vmatpush1.bf16.msra.mxu0 %v3548_v17  ;;  %2144 = vmatpush1.bf16.msra.mxu1 %v3551_v18  ;;  %v3637_v17 = vld [vmem:[#allocation5 + $0x530] ss:$20 sps:$4 sm:$0xff]   ;;  %v3642_v18 = vld [vmem:[#allocation5 + $0x554] ss:$20 sps:$4 sm:$0xff]  }
  0xab   :  { %1981 = vmatprep.subr.bf16.mxu0 %v3556_v19  ;;  %2145 = vmatprep.subr.bf16.mxu1 %v3559_v20  ;;  %v3645_v19 = vld [vmem:[#allocation5 + $0x55c] ss:$20 sps:$4 sm:$0xff]  }
  0xac   :  { %v3640_v20 = vld [vmem:[#allocation5 + $0x550] ss:$20 sps:$4 sm:$0xff]  }
  0xae   :  { %1982 = vmatpush1.bf16.msra.mxu0 %v3554_v21  ;;  %2146 = vmatpush1.bf16.msra.mxu1 %v3557_v22  ;;  %v3643_v21 = vld [vmem:[#allocation5 + $0x558] ss:$20 sps:$4 sm:$0xff]   ;;  %v3648_v22 = vld [vmem:[#allocation5 + $0x57c] ss:$20 sps:$4 sm:$0xff]  }
  0xaf   :  { %1983 = vmatprep.subr.bf16.mxu0 %v3562_v23  ;;  %2147 = vmatprep.subr.bf16.mxu1 %v3565_v24  ;;  %v3651_v23 = vld [vmem:[#allocation5 + $0x584] ss:$20 sps:$4 sm:$0xff]  }
  0xb0   :  { %v3646_v24 = vld [vmem:[#allocation5 + $0x578] ss:$20 sps:$4 sm:$0xff]  }
  0xb2   :  { %1984 = vmatpush1.bf16.msra.mxu0 %v3560_v25  ;;  %2148 = vmatpush1.bf16.msra.mxu1 %v3563_v26  ;;  %v3649_v25 = vld [vmem:[#allocation5 + $0x580] ss:$20 sps:$4 sm:$0xff]   ;;  %v3654_v26 = vld [vmem:[#allocation5 + $0x5a4] ss:$20 sps:$4 sm:$0xff]  }
  0xb3   :  { %1985 = vmatprep.subr.bf16.mxu0 %v3568_v27  ;;  %2149 = vmatprep.subr.bf16.mxu1 %v3571_v28  ;;  %v3657_v27 = vld [vmem:[#allocation5 + $0x5ac] ss:$20 sps:$4 sm:$0xff]  }
  0xb4   :  { %v3652_v28 = vld [vmem:[#allocation5 + $0x5a0] ss:$20 sps:$4 sm:$0xff]  }
  0xb6   :  { %1986 = vmatpush1.bf16.msra.mxu0 %v3566_v31  ;;  %2150 = vmatpush1.bf16.msra.mxu1 %v3569_v32  ;;  %v3660_v31 = vld [vmem:[#allocation5 + $0x5cc] ss:$20 sps:$4 sm:$0xff]   ;;  %v3663_v32 = vld [vmem:[#allocation5 + $0x5d4] ss:$20 sps:$4 sm:$0xff]  }
  0xb7   :  { %1987 = vmatprep.subr.bf16.mxu0 %v3574_v33  ;;  %2151 = vmatprep.subr.bf16.mxu1 %v3577_v34  ;;  %v3658_v33 = vld [vmem:[#allocation5 + $0x5c8] ss:$20 sps:$4 sm:$0xff]   ;;  %v3661_v34 = vld [vmem:[#allocation5 + $0x5d0] ss:$20 sps:$4 sm:$0xff]  }
  0xba   :  { %1988 = vmatpush1.bf16.msra.mxu0 %v3572_v35  ;;  %2152 = vmatpush1.bf16.msra.mxu1 %v3575_v36  ;;  %v3666_v35 = vld [vmem:[#allocation5 + $0x5f4] ss:$20 sps:$4 sm:$0xff]   ;;  %v3669_v36 = vld [vmem:[#allocation5 + $0x5fc] ss:$20 sps:$4 sm:$0xff]  }
  0xbb   :  { %1989 = vmatprep.subr.bf16.mxu0 %v3580_v37  ;;  %2153 = vmatprep.subr.bf16.mxu1 %v3583_v38  ;;  %v3664_v37 = vld [vmem:[#allocation5 + $0x5f0] ss:$20 sps:$4 sm:$0xff]   ;;  %v3667_v38 = vld [vmem:[#allocation5 + $0x5f8] ss:$20 sps:$4 sm:$0xff]  }
  0xbe   :  { %1990 = vmatpush1.bf16.msra.mxu0 %v3578_v39  ;;  %2154 = vmatpush1.bf16.msra.mxu1 %v3581_v40  ;;  %v3672_v39 = vld [vmem:[#allocation5 + $0x61c] ss:$20 sps:$4 sm:$0xff]   ;;  %v3675_v40 = vld [vmem:[#allocation5 + $0x624] ss:$20 sps:$4 sm:$0xff]  }
  0xbf   :  { %1991 = vmatprep.subr.bf16.mxu0 %v3586_v41  ;;  %2155 = vmatprep.subr.bf16.mxu1 %v3589_v42  ;;  %v3670_v41 = vld [vmem:[#allocation5 + $0x618] ss:$20 sps:$4 sm:$0xff]   ;;  %v3673_v42 = vld [vmem:[#allocation5 + $0x620] ss:$20 sps:$4 sm:$0xff]  }
  0xc2   :  { %1992 = vmatpush1.bf16.msra.mxu0 %v3584_v43  ;;  %2156 = vmatpush1.bf16.msra.mxu1 %v3587_v44  ;;  %v3678_v43 = vld [vmem:[#allocation5 + $0x644] ss:$20 sps:$4 sm:$0xff]   ;;  %v3681_v44 = vld [vmem:[#allocation5 + $0x64c] ss:$20 sps:$4 sm:$0xff]  }
  0xc3   :  { %1993 = vmatprep.subr.bf16.mxu0 %v3592_v45  ;;  %2157 = vmatprep.subr.bf16.mxu1 %v3595_v46  ;;  %v3676_v45 = vld [vmem:[#allocation5 + $0x640] ss:$20 sps:$4 sm:$0xff]   ;;  %v3679_v46 = vld [vmem:[#allocation5 + $0x648] ss:$20 sps:$4 sm:$0xff]  }
  0xc6   :  { %1994 = vmatpush1.bf16.msra.mxu0 %v3590_v47  ;;  %2158 = vmatpush1.bf16.msra.mxu1 %v3593_v49  ;;  %v3684_v47 = vld [vmem:[#allocation5 + $0x66c] ss:$20 sps:$4 sm:$0xff]   ;;  %v3687_v49 = vld [vmem:[#allocation5 + $0x674] ss:$20 sps:$4 sm:$0xff]  }
  0xc7   :  { %1995 = vmatprep.subr.bf16.mxu0 %v3598_v50  ;;  %2159 = vmatprep.subr.bf16.mxu1 %v3601_v51  ;;  %v3682_v50 = vld [vmem:[#allocation5 + $0x668] ss:$20 sps:$4 sm:$0xff]   ;;  %v3685_v51 = vld [vmem:[#allocation5 + $0x670] ss:$20 sps:$4 sm:$0xff]  }
  0xca   :  { %1996 = vmatpush1.bf16.msra.mxu0 %v3596_v52  ;;  %2160 = vmatpush1.bf16.msra.mxu1 %v3599_v53  ;;  %v3690_v52 = vld [vmem:[#allocation5 + $0x694] ss:$20 sps:$4 sm:$0xff]   ;;  %v3693_v53 = vld [vmem:[#allocation5 + $0x69c] ss:$20 sps:$4 sm:$0xff]  }
  0xcb   :  { %1997 = vmatprep.subr.bf16.mxu0 %v3604_v54  ;;  %2161 = vmatprep.subr.bf16.mxu1 %v3607_v55  ;;  %v3688_v54 = vld [vmem:[#allocation5 + $0x690] ss:$20 sps:$4 sm:$0xff]   ;;  %v3691_v55 = vld [vmem:[#allocation5 + $0x698] ss:$20 sps:$4 sm:$0xff]  }
  0xce   :  { %1998 = vmatpush1.bf16.msra.mxu0 %v3602_v56  ;;  %2162 = vmatpush1.bf16.msra.mxu1 %v3605_v57  ;;  %v3696_v56 = vld [vmem:[#allocation5 + $0x6bc] ss:$20 sps:$4 sm:$0xff]   ;;  %v3699_v57 = vld [vmem:[#allocation5 + $0x6c4] ss:$20 sps:$4 sm:$0xff]  }
  0xcf   :  { %1999 = vmatprep.subr.bf16.mxu0 %v3610_v58  ;;  %2163 = vmatprep.subr.bf16.mxu1 %v3613_v59  ;;  %v3694_v58 = vld [vmem:[#allocation5 + $0x6b8] ss:$20 sps:$4 sm:$0xff]   ;;  %v3697_v59 = vld [vmem:[#allocation5 + $0x6c0] ss:$20 sps:$4 sm:$0xff]  }
  0xd2   :  { %2000 = vmatpush1.bf16.msra.mxu0 %v3608_v60  ;;  %2164 = vmatpush1.bf16.msra.mxu1 %v3611_v61  ;;  %v3702_v60 = vld [vmem:[#allocation5 + $0x6e4] ss:$20 sps:$4 sm:$0xff]   ;;  %v3705_v61 = vld [vmem:[#allocation5 + $0x6ec] ss:$20 sps:$4 sm:$0xff]  }
  0xd3   :  { %2001 = vmatprep.subr.bf16.mxu0 %v3616_v62  ;;  %2165 = vmatprep.subr.bf16.mxu1 %v3619_v63  ;;  %v3700_v62 = vld [vmem:[#allocation5 + $0x6e0] ss:$20 sps:$4 sm:$0xff]   ;;  %v3703_v63 = vld [vmem:[#allocation5 + $0x6e8] ss:$20 sps:$4 sm:$0xff]  }
  0xd6   :  { %2002 = vmatpush1.bf16.msra.mxu0 %v3614_v0  ;;  %2166 = vmatpush1.bf16.msra.mxu1 %v3617_v1  ;;  %v3708_v0 = vld [vmem:[#allocation5 + $0x70c] ss:$20 sps:$4 sm:$0xff]   ;;  %v3711_v1 = vld [vmem:[#allocation5 + $0x714] ss:$20 sps:$4 sm:$0xff]  }
  0xd7   :  { %2003 = vmatprep.subr.bf16.mxu0 %v3622_v2  ;;  %2167 = vmatprep.subr.bf16.mxu1 %v3625_v3  ;;  %v3706_v2 = vld [vmem:[#allocation5 + $0x708] ss:$20 sps:$4 sm:$0xff]   ;;  %v3709_v3 = vld [vmem:[#allocation5 + $0x710] ss:$20 sps:$4 sm:$0xff]  }
  0xda   :  { %2004 = vmatpush1.bf16.msra.mxu0 %v3620_v4  ;;  %2168 = vmatpush1.bf16.msra.mxu1 %v3623_v6  ;;  %v3714_v4 = vld [vmem:[#allocation5 + $0x734] ss:$20 sps:$4 sm:$0xff]   ;;  %v3717_v6 = vld [vmem:[#allocation5 + $0x73c] ss:$20 sps:$4 sm:$0xff]  }
  0xdb   :  { %2014 = vmatprep.subr.bf16.mxu0 %v3630_v7  ;;  %2178 = vmatprep.subr.bf16.mxu1 %v3633_v8  ;;  %v3712_v7 = vld [vmem:[#allocation5 + $0x730] ss:$20 sps:$4 sm:$0xff]   ;;  %v3715_v8 = vld [vmem:[#allocation5 + $0x738] ss:$20 sps:$4 sm:$0xff]  }
  0xdd   :  { %2006 = vmatmul.mubr.bf16.vlgmr.msra.gmra.mrb[0].mxu0 %v4132_v9  ;;  %2170 = vmatmul.mubr.bf16.vlgmr.msra.gmra.mrb[0].mxu1 %v4132_v9 }
  0xde   :  { %2015 = vmatpush1.bf16.msra.mxu0 %v3628_v10  ;;  %2179 = vmatpush1.bf16.msra.mxu1 %v3631_v11  ;;  %v3720_v10 = vld [vmem:[#allocation5 + $0x75c] ss:$20 sps:$4 sm:$0xff]   ;;  %v3723_v11 = vld [vmem:[#allocation5 + $0x764] ss:$20 sps:$4 sm:$0xff]  }
  0xdf   :  { %2016 = vmatprep.subr.bf16.mxu0 %v3636_v12  ;;  %2180 = vmatprep.subr.bf16.mxu1 %v3639_v14  ;;  %v3718_v12 = vld [vmem:[#allocation5 + $0x758] ss:$20 sps:$4 sm:$0xff]   ;;  %v3721_v14 = vld [vmem:[#allocation5 + $0x760] ss:$20 sps:$4 sm:$0xff]  }
  0xe0   :  { %2046 = vmatprep.mubr.bf16.mxu0 %v4138_v15  ;;  %2210 = vmatprep.mubr.bf16.mxu1 %v4138_v15 }
  0xe2   :  { %2017 = vmatpush1.bf16.msra.mxu0 %v3634_v16  ;;  %2181 = vmatpush1.bf16.msra.mxu1 %v3637_v17  ;;  %v3728_v16 = vld [vmem:[#allocation5 + $0x784] ss:$20 sps:$4 sm:$0xff]   ;;  %v3731_v17 = vld [vmem:[#allocation5 + $0x78c] ss:$20 sps:$4 sm:$0xff]  }
  0xe3   :  { %2018 = vmatprep.subr.bf16.mxu0 %v3642_v18  ;;  %2182 = vmatprep.subr.bf16.mxu1 %v3645_v19  ;;  %v3726_v18 = vld [vmem:[#allocation5 + $0x780] ss:$20 sps:$4 sm:$0xff]   ;;  %v4146_v19 = vcombine.low %v4134_v13, %v4134_v13  ;;  %v3743_v13 = vld [vmem:[#allocation5 + $0x7dc] ss:$20 sps:$4 sm:$0xff]  }
  0xe6   :  { %2019 = vmatpush1.bf16.msra.mxu0 %v3640_v20  ;;  %2183 = vmatpush1.bf16.msra.mxu1 %v3643_v21  ;;  %v3729_v20 = vld [vmem:[#allocation5 + $0x788] ss:$20 sps:$4 sm:$0xff]   ;;  %v3734_v21 = vld [vmem:[#allocation5 + $0x7ac] ss:$20 sps:$4 sm:$0xff]  }
  0xe7   :  { %2020 = vmatprep.subr.bf16.mxu0 %v3648_v22  ;;  %2184 = vmatprep.subr.bf16.mxu1 %v3651_v23  ;;  %v3737_v22 = vld [vmem:[#allocation5 + $0x7b4] ss:$20 sps:$4 sm:$0xff]  }
  0xe8   :  { %v3732_v23 = vld [vmem:[#allocation5 + $0x7a8] ss:$20 sps:$4 sm:$0xff]  }
  0xea   :  { %2021 = vmatpush1.bf16.msra.mxu0 %v3646_v24  ;;  %2185 = vmatpush1.bf16.msra.mxu1 %v3649_v25  ;;  %v3735_v24 = vld [vmem:[#allocation5 + $0x7b0] ss:$20 sps:$4 sm:$0xff]   ;;  %v3740_v25 = vld [vmem:[#allocation5 + $0x7d4] ss:$20 sps:$4 sm:$0xff]  }
  0xeb   :  { %2022 = vmatprep.subr.bf16.mxu0 %v3654_v26  ;;  %2186 = vmatprep.subr.bf16.mxu1 %v3657_v27  ;;  %v3738_v26 = vld [vmem:[#allocation5 + $0x7d0] ss:$20 sps:$4 sm:$0xff]   ;;  %v4020_v27 = vmov 0  }
  0xee   :  { %2023 = vmatpush1.bf16.msra.mxu0 %v3652_v28  ;;  %2187 = vmatpush1.bf16.msra.mxu1 %v3655_v29  ;;  %v3741_v28 = vld [vmem:[#allocation5 + $0x7d8] ss:$20 sps:$4 sm:$0xff]   ;;  %v3746_v29 = vld [vmem:[#allocation5 + $0x7fc] ss:$20 sps:$4 sm:$0xff]  }
  0xef   :  { %2024 = vmatprep.subr.bf16.mxu0 %v3660_v31  ;;  %2188 = vmatprep.subr.bf16.mxu1 %v3663_v32  ;;  %v3749_v31 = vld [vmem:[#allocation5 + $0x804] ss:$20 sps:$4 sm:$0xff]  }
  0xf0   :  { %v3744_v32 = vld [vmem:[#allocation5 + $0x7f8] ss:$20 sps:$4 sm:$0xff]  }
  0xf2   :  { %2025 = vmatpush1.bf16.msra.mxu0 %v3658_v33  ;;  %2189 = vmatpush1.bf16.msra.mxu1 %v3661_v34  ;;  %v3747_v33 = vld [vmem:[#allocation5 + $0x800] ss:$20 sps:$4 sm:$0xff]   ;;  %v3752_v34 = vld [vmem:[#allocation5 + $0x824] ss:$20 sps:$4 sm:$0xff]  }
  0xf3   :  { %2026 = vmatprep.subr.bf16.mxu0 %v3666_v35  ;;  %2190 = vmatprep.subr.bf16.mxu1 %v3669_v36  ;;  %v3755_v35 = vld [vmem:[#allocation5 + $0x82c] ss:$20 sps:$4 sm:$0xff]  }
  0xf4   :  { %v3750_v36 = vld [vmem:[#allocation5 + $0x820] ss:$20 sps:$4 sm:$0xff]  }
  0xf6   :  { %2027 = vmatpush1.bf16.msra.mxu0 %v3664_v37  ;;  %2191 = vmatpush1.bf16.msra.mxu1 %v3667_v38  ;;  %v3753_v37 = vld [vmem:[#allocation5 + $0x828] ss:$20 sps:$4 sm:$0xff]   ;;  %v3758_v38 = vld [vmem:[#allocation5 + $0x84c] ss:$20 sps:$4 sm:$0xff]  }
  0xf7   :  { %2028 = vmatprep.subr.bf16.mxu0 %v3672_v39  ;;  %2192 = vmatprep.subr.bf16.mxu1 %v3675_v40  ;;  %v3761_v39 = vld [vmem:[#allocation5 + $0x854] ss:$20 sps:$4 sm:$0xff]  }
  0xf8   :  { %v3756_v40 = vld [vmem:[#allocation5 + $0x848] ss:$20 sps:$4 sm:$0xff]  }
  0xfa   :  { %2029 = vmatpush1.bf16.msra.mxu0 %v3670_v41  ;;  %2193 = vmatpush1.bf16.msra.mxu1 %v3673_v42  ;;  %v3759_v41 = vld [vmem:[#allocation5 + $0x850] ss:$20 sps:$4 sm:$0xff]   ;;  %v3764_v42 = vld [vmem:[#allocation5 + $0x874] ss:$20 sps:$4 sm:$0xff]  }
  0xfb   :  { %2030 = vmatprep.subr.bf16.mxu0 %v3678_v43  ;;  %2194 = vmatprep.subr.bf16.mxu1 %v3681_v44  ;;  %v3767_v43 = vld [vmem:[#allocation5 + $0x87c] ss:$20 sps:$4 sm:$0xff]  }
  0xfc   :  { %v3762_v44 = vld [vmem:[#allocation5 + $0x870] ss:$20 sps:$4 sm:$0xff]  }
  0xfe   :  { %2031 = vmatpush1.bf16.msra.mxu0 %v3676_v45  ;;  %2195 = vmatpush1.bf16.msra.mxu1 %v3679_v46  ;;  %v3765_v45 = vld [vmem:[#allocation5 + $0x878] ss:$20 sps:$4 sm:$0xff]   ;;  %v3770_v46 = vld [vmem:[#allocation5 + $0x89c] ss:$20 sps:$4 sm:$0xff]  }
  0xff   :  { %2032 = vmatprep.subr.bf16.mxu0 %v3684_v47  ;;  %2196 = vmatprep.subr.bf16.mxu1 %v3687_v49  ;;  %v3773_v47 = vld [vmem:[#allocation5 + $0x8a4] ss:$20 sps:$4 sm:$0xff]  }
 0x100   :  { %v3768_v49 = vld [vmem:[#allocation5 + $0x898] ss:$20 sps:$4 sm:$0xff]  }
 0x102   :  { %2033 = vmatpush1.bf16.msra.mxu0 %v3682_v50  ;;  %2197 = vmatpush1.bf16.msra.mxu1 %v3685_v51  ;;  %v3771_v50 = vld [vmem:[#allocation5 + $0x8a0] ss:$20 sps:$4 sm:$0xff]   ;;  %v3775_v51 = vld [vmem:[#allocation5 + $0x150] ss:$20 sps:$4 sm:$0xff]  }
 0x103   :  { %2034 = vmatprep.subr.bf16.mxu0 %v3690_v52  ;;  %2198 = vmatprep.subr.bf16.mxu1 %v3693_v53  ;;  %v4150_v52 = vld [vmem:[#allocation2 + $0x18] ss:$0 sps:$4 sm:$0xff]   ;;  %v3777_v53 = vld [vmem:[#allocation5 + $0x3d0] ss:$20 sps:$4 sm:$0xff]  }
 0x106   :  { %2035 = vmatpush1.bf16.msra.mxu0 %v3688_v54  ;;  %2199 = vmatpush1.bf16.msra.mxu1 %v3691_v55  ;;  %v3776_v54 = vld [vmem:[#allocation5 + $0x10] ss:$20 sps:$4 sm:$0xff]  }
 0x107   :  { %2036 = vmatprep.subr.bf16.mxu0 %v3696_v56  ;;  %2200 = vmatprep.subr.bf16.mxu1 %v3699_v57  ;;  %v3778_v55 = vld [vmem:[#allocation5 + $0x290] ss:$20 sps:$4 sm:$0xff]   ;;  %v3779_v56 = vld [vmem:[#allocation5 + $0x178] ss:$20 sps:$4 sm:$0xff]  }
 0x108   :  { %v3781_v57 = vld [vmem:[#allocation5 + $0x3f8] ss:$20 sps:$4 sm:$0xff]  }
 0x10a   :  { %2037 = vmatpush1.bf16.msra.mxu0 %v3694_v58  ;;  %2201 = vmatpush1.bf16.msra.mxu1 %v3697_v59  ;;  %v3780_v58 = vld [vmem:[#allocation5 + $0x38] ss:$20 sps:$4 sm:$0xff]  }
 0x10b   :  { %2038 = vmatprep.subr.bf16.mxu0 %v3702_v60  ;;  %2202 = vmatprep.subr.bf16.mxu1 %v3705_v61  ;;  %v3782_v59 = vld [vmem:[#allocation5 + $0x2b8] ss:$20 sps:$4 sm:$0xff]   ;;  %v3783_v60 = vld [vmem:[#allocation5 + $0x1a0] ss:$20 sps:$4 sm:$0xff]  }
 0x10c   :  { %v3785_v61 = vld [vmem:[#allocation5 + $0x420] ss:$20 sps:$4 sm:$0xff]  }
 0x10e   :  { %2039 = vmatpush1.bf16.msra.mxu0 %v3700_v62  ;;  %2203 = vmatpush1.bf16.msra.mxu1 %v3703_v63  ;;  %v3784_v62 = vld [vmem:[#allocation5 + $0x60] ss:$20 sps:$4 sm:$0xff]  }
 0x10f   :  { %2040 = vmatprep.subr.bf16.mxu0 %v3708_v0  ;;  %2204 = vmatprep.subr.bf16.mxu1 %v3711_v1  ;;  %v3786_v63 = vld [vmem:[#allocation5 + $0x2e0] ss:$20 sps:$4 sm:$0xff]   ;;  %v3787_v0 = vld [vmem:[#allocation5 + $0x1c8] ss:$20 sps:$4 sm:$0xff]  }
 0x110   :  { %v3789_v1 = vld [vmem:[#allocation5 + $0x448] ss:$20 sps:$4 sm:$0xff]  }
 0x112   :  { %2041 = vmatpush1.bf16.msra.mxu0 %v3706_v2  ;;  %2205 = vmatpush1.bf16.msra.mxu1 %v3709_v3  ;;  %v3788_v2 = vld [vmem:[#allocation5 + $0x88] ss:$20 sps:$4 sm:$0xff]  }
 0x113   :  { %2042 = vmatprep.subr.bf16.mxu0 %v3714_v4  ;;  %2206 = vmatprep.subr.bf16.mxu1 %v3717_v6  ;;  %v3790_v3 = vld [vmem:[#allocation5 + $0x308] ss:$20 sps:$4 sm:$0xff]   ;;  %v3791_v4 = vld [vmem:[#allocation5 + $0x1f0] ss:$20 sps:$4 sm:$0xff]  }
 0x114   :  { %v3793_v6 = vld [vmem:[#allocation5 + $0x470] ss:$20 sps:$4 sm:$0xff]  }
 0x116   :  { %2043 = vmatpush1.bf16.msra.mxu0 %v3712_v7  ;;  %2207 = vmatpush1.bf16.msra.mxu1 %v3715_v8  ;;  %v3792_v7 = vld [vmem:[#allocation5 + $0xb0] ss:$20 sps:$4 sm:$0xff]  }
 0x117   :  { %2044 = vmatprep.subr.bf16.mxu0 %v3720_v10  ;;  %2208 = vmatprep.subr.bf16.mxu1 %v3723_v11  ;;  %v3794_v8 = vld [vmem:[#allocation5 + $0x330] ss:$20 sps:$4 sm:$0xff]   ;;  %v3795_v10 = vld [vmem:[#allocation5 + $0x218] ss:$20 sps:$4 sm:$0xff]  }
 0x118   :  { %v3798_v11 = vld [vmem:[#allocation5 + $0x358] ss:$20 sps:$4 sm:$0xff]  }
 0x11a   :  { %2045 = vmatpush1.bf16.msra.mxu0 %v3718_v12  ;;  %2209 = vmatpush1.bf16.msra.mxu1 %v3721_v14  ;;  %v3799_v12 = vld [vmem:[#allocation5 + $0x240] ss:$20 sps:$4 sm:$0xff]  }
 0x11b   :  { %2055 = vmatprep.subr.bf16.mxu0 %v3728_v16  ;;  %2219 = vmatprep.subr.bf16.mxu1 %v3731_v17  ;;  %v3801_v14 = vld [vmem:[#allocation5 + $0x4c0] ss:$20 sps:$4 sm:$0xff]  }
 0x11c   :  { %v3800_v16 = vld [vmem:[#allocation5 + $0x100] ss:$20 sps:$4 sm:$0xff]  }
 0x11d   :  { %2047 = vmatmul.mubr.bf16.vlgmr.msra.gmra.mrb[0].mxu0 %v4146_v19  ;;  %2211 = vmatmul.mubr.bf16.vlgmr.msra.gmra.mrb[0].mxu1 %v4146_v19  ;;  %v3802_v17 = vld [vmem:[#allocation5 + $0x380] ss:$20 sps:$4 sm:$0xff]  }
 0x11e   :  { %2056 = vmatpush1.bf16.msra.mxu0 %v3726_v18  ;;  %2220 = vmatpush1.bf16.msra.mxu1 %v3729_v20  ;;  %v3803_v18 = vld [vmem:[#allocation5 + $0x268] ss:$20 sps:$4 sm:$0xff]  }
 0x11f   :  { %2057 = vmatprep.subr.bf16.mxu0 %v3734_v21  ;;  %2221 = vmatprep.subr.bf16.mxu1 %v3737_v22  ;;  %v3805_v20 = vld [vmem:[#allocation5 + $0x4e8] ss:$20 sps:$4 sm:$0xff]  }
 0x120   :  { %2087 = vmatprep.mubr.bf16.mxu0 %v4020_v27  ;;  %2251 = vmatprep.mubr.bf16.mxu1 %v4020_v27  ;;  %v3804_v21 = vld [vmem:[#allocation5 + $0x128] ss:$20 sps:$4 sm:$0xff]   ;;  %v3811_v27 = vld [vmem:[#allocation5 + $0x538] ss:$20 sps:$4 sm:$0xff]  }
 0x121   :  { %v3806_v22 = vld [vmem:[#allocation5 + $0x3a8] ss:$20 sps:$4 sm:$0xff]  }
 0x122   :  { %2058 = vmatpush1.bf16.msra.mxu0 %v3732_v23  ;;  %2222 = vmatpush1.bf16.msra.mxu1 %v3735_v24  ;;  %v3807_v23 = vld [vmem:[#allocation5 + $0x650] ss:$20 sps:$4 sm:$0xff]  }
 0x123   :  { %2059 = vmatprep.subr.bf16.mxu0 %v3740_v25  ;;  %2223 = vmatprep.subr.bf16.mxu1 %v3743_v13  ;;  %v3808_v24 = vld [vmem:[#allocation5 + $0x510] ss:$20 sps:$4 sm:$0xff]   ;;  %v4021_v13 = vmov 0.0  }
 0x124   :  { %v3809_v25 = vld [vmem:[#allocation5 + $0x790] ss:$20 sps:$4 sm:$0xff]  }
 0x126   :  { %2060 = vmatpush1.bf16.msra.mxu0 %v3738_v26  ;;  %2224 = vmatpush1.bf16.msra.mxu1 %v3741_v28  ;;  %v3810_v26 = vld [vmem:[#allocation5 + $0x678] ss:$20 sps:$4 sm:$0xff]  }
 0x127   :  { %2061 = vmatprep.subr.bf16.mxu0 %v3746_v29  ;;  %2225 = vmatprep.subr.bf16.mxu1 %v3749_v31  ;;  %v3812_v28 = vld [vmem:[#allocation5 + $0x7b8] ss:$20 sps:$4 sm:$0xff]   ;;  %v3813_v29 = vld [vmem:[#allocation5 + $0x6a0] ss:$20 sps:$4 sm:$0xff]  }
 0x128   :  { %v3814_v31 = vld [vmem:[#allocation5 + $0x560] ss:$20 sps:$4 sm:$0xff]  }
 0x12a   :  { %2062 = vmatpush1.bf16.msra.mxu0 %v3744_v32  ;;  %2226 = vmatpush1.bf16.msra.mxu1 %v3747_v33  ;;  %v3817_v32 = vld [vmem:[#allocation5 + $0x588] ss:$20 sps:$4 sm:$0xff]  }
 0x12b   :  { %2063 = vmatprep.subr.bf16.mxu0 %v3752_v34  ;;  %2227 = vmatprep.subr.bf16.mxu1 %v3755_v35  ;;  %v3818_v33 = vld [vmem:[#allocation5 + $0x808] ss:$20 sps:$4 sm:$0xff]   ;;  %v3820_v34 = vld [vmem:[#allocation5 + $0x5b0] ss:$20 sps:$4 sm:$0xff]  }
 0x12c   :  { %v3821_v35 = vld [vmem:[#allocation5 + $0x830] ss:$20 sps:$4 sm:$0xff]  }
 0x12e   :  { %2064 = vmatpush1.bf16.msra.mxu0 %v3750_v36  ;;  %2228 = vmatpush1.bf16.msra.mxu1 %v3753_v37  ;;  %v3822_v36 = vld [vmem:[#allocation5 + $0x718] ss:$20 sps:$4 sm:$0xff]  }
 0x12f   :  { %2065 = vmatprep.subr.bf16.mxu0 %v3758_v38  ;;  %2229 = vmatprep.subr.bf16.mxu1 %v3761_v39  ;;  %v3823_v37 = vld [vmem:[#allocation5 + $0x5d8] ss:$20 sps:$4 sm:$0xff]   ;;  %v3825_v39 = vld [vmem:[#allocation5 + $0x740] ss:$20 sps:$4 sm:$0xff]  }
 0x130   :  { %v3824_v38 = vld [vmem:[#allocation5 + $0x858] ss:$20 sps:$4 sm:$0xff]  }
 0x132   :  { %2066 = vmatpush1.bf16.msra.mxu0 %v3756_v40  ;;  %2230 = vmatpush1.bf16.msra.mxu1 %v3759_v41  ;;  %v3826_v40 = vld [vmem:[#allocation5 + $0x600] ss:$20 sps:$4 sm:$0xff]  }
 0x133   :  { %2067 = vmatprep.subr.bf16.mxu0 %v3764_v42  ;;  %2231 = vmatprep.subr.bf16.mxu1 %v3767_v43  ;;  %v3827_v41 = vld [vmem:[#allocation5 + $0x880] ss:$20 sps:$4 sm:$0xff]   ;;  %v3828_v42 = vld [vmem:[#allocation5 + $0x768] ss:$20 sps:$4 sm:$0xff]  }
 0x134   :  { %v3829_v43 = vld [vmem:[#allocation5 + $0x628] ss:$20 sps:$4 sm:$0xff]  }
 0x136   :  { %2068 = vmatpush1.bf16.msra.mxu0 %v3762_v44  ;;  %2232 = vmatpush1.bf16.msra.mxu1 %v3765_v45  ;;  %v3830_v44 = vld [vmem:[#allocation5 + $0x8a8] ss:$20 sps:$4 sm:$0xff]  }
 0x137   :  { %2069 = vmatprep.subr.bf16.mxu0 %v3770_v46  ;;  %2233 = vmatprep.subr.bf16.mxu1 %v3773_v47  ;;  %v3831_v45 = vld [vmem:[#allocation8 + $0x40] sm:$0xff]  }
 0x138   :  { %v3832_v46 = vld [vmem:[#allocation8 + $0xc0] sm:$0xff]  }
 0x139   :  { %v3833_v47 = vld [vmem:[#allocation8] sm:$0xff]  }
 0x13a   :  { %2070 = vmatpush1.bf16.msra.mxu0 %v3768_v49  ;;  %2234 = vmatpush1.bf16.msra.mxu1 %v3771_v50  ;;  %v3834_v49 = vld [vmem:[#allocation8 + $0x80] sm:$0xff]   ;;  %v3835_v50 = vld [vmem:[#allocation8 + $0x48] sm:$0xff]  }
 0x13b   :  { %3223 = vmatprep.subr.bf16.mxu0 %v3775_v51  ;;  %3245 = vmatprep.subr.bf16.mxu1 %v3777_v53  ;;  %v3836_v51 = vld [vmem:[#allocation8 + $0xc8] sm:$0xff]  }
 0x13c   :  { %v3837_v53 = vld [vmem:[#allocation8 + $0x8] sm:$0xff]  }
 0x13d   :  { %2088 = vmatmul.mubr.bf16.vlgmr.msra.gmra.mrb[0].mxu0 %v4150_v52  ;;  %2252 = vmatmul.mubr.bf16.vlgmr.msra.gmra.mrb[0].mxu1 %v4150_v52 }
 0x13e   :  { %3224 = vmatpush3.bf16.msra.mxu0 %v3776_v54  ;;  %3246 = vmatpush3.bf16.msra.mxu1 %v3778_v55  ;;  %v3838_v54 = vld [vmem:[#allocation8 + $0x88] sm:$0xff]   ;;  %v3839_v55 = vld [vmem:[#allocation8 + $0x50] sm:$0xff]  }
 0x13f   :  { %3225 = vmatprep.subr.bf16.mxu0 %v3779_v56  ;;  %3247 = vmatprep.subr.bf16.mxu1 %v3781_v57  ;;  %v3840_v56 = vld [vmem:[#allocation8 + $0xd0] sm:$0xff]  }
 0x140   :  { %2292 = vmatprep.mubr.bf16.mxu0 %v4114_v48  ;;  %2332 = vmatprep.mubr.bf16.mxu1 %v4126_v30  ;;  %v3797_v48 = vld [vmem:[#allocation5 + $0x498] ss:$20 sps:$4 sm:$0xff]  }
 0x141   :  { %v3796_v30 = vld [vmem:[#allocation5 + $0xd8] ss:$20 sps:$4 sm:$0xff]  }
 0x142   :  { %3226 = vmatpush3.bf16.msra.mxu0 %v3780_v58  ;;  %3248 = vmatpush3.bf16.msra.mxu1 %v3782_v59  ;;  %v3841_v57 = vld [vmem:[#allocation8 + $0x10] sm:$0xff]   ;;  %v3843_v59 = vld [vmem:[#allocation8 + $0x58] sm:$0xff]  }
 0x143   :  { %3227 = vmatprep.subr.bf16.mxu0 %v3783_v60  ;;  %3249 = vmatprep.subr.bf16.mxu1 %v3785_v61  ;;  %v3842_v58 = vld [vmem:[#allocation8 + $0x90] sm:$0xff]   ;;  %v3844_v60 = vld [vmem:[#allocation8 + $0xd8] sm:$0xff]   ;;  %v3847_v61 = vld [vmem:[#allocation8 + $0x60] sm:$0xff]  }
 0x146   :  { %3228 = vmatpush3.bf16.msra.mxu0 %v3784_v62  ;;  %3250 = vmatpush3.bf16.msra.mxu1 %v3786_v63  ;;  %v3848_v62 = vld [vmem:[#allocation8 + $0xe0] sm:$0xff]  }
 0x147   :  { %3229 = vmatprep.subr.bf16.mxu0 %v3787_v0  ;;  %3251 = vmatprep.subr.bf16.mxu1 %v3789_v1  ;;  %v3849_v63 = vld [vmem:[#allocation8 + $0x20] sm:$0xff]   ;;  %v3851_v1 = vld [vmem:[#allocation8 + $0x68] sm:$0xff]  }
 0x148   :  { %v3850_v0 = vld [vmem:[#allocation8 + $0xa0] sm:$0xff]  }
 0x14a   :  { %3230 = vmatpush3.bf16.msra.mxu0 %v3788_v2  ;;  %3252 = vmatpush3.bf16.msra.mxu1 %v3790_v3  ;;  %v3852_v2 = vld [vmem:[#allocation8 + $0xe8] sm:$0xff]  }
 0x14b   :  { %3231 = vmatprep.subr.bf16.mxu0 %v3791_v4  ;;  %3253 = vmatprep.subr.bf16.mxu1 %v3793_v6  ;;  %v3853_v3 = vld [vmem:[#allocation8 + $0x28] sm:$0xff]   ;;  %v3855_v6 = vld [vmem:[#allocation8 + $0x70] sm:$0xff]  }
 0x14c   :  { %v3854_v4 = vld [vmem:[#allocation8 + $0xa8] sm:$0xff]  }
 0x14e   :  { %3232 = vmatpush3.bf16.msra.mxu0 %v3792_v7  ;;  %3254 = vmatpush3.bf16.msra.mxu1 %v3794_v8  ;;  %v3856_v7 = vld [vmem:[#allocation8 + $0xf0] sm:$0xff]  }
 0x14f   :  { %3233 = vmatprep.subr.bf16.mxu0 %v3795_v10  ;;  %3255 = vmatprep.subr.bf16.mxu1 %v3797_v48  ;;  %v3857_v8 = vld [vmem:[#allocation8 + $0x30] sm:$0xff]   ;;  %v3859_v48 = vld [vmem:[#allocation8 + $0x78] sm:$0xff]  }
 0x150   :  { %v3858_v10 = vld [vmem:[#allocation8 + $0xb0] sm:$0xff]  }
 0x152   :  { %3234 = vmatpush3.bf16.msra.mxu0 %v3796_v30  ;;  %3256 = vmatpush3.bf16.msra.mxu1 %v3798_v11  ;;  %v3860_v30 = vld [vmem:[#allocation8 + $0xf8] sm:$0xff]  }
 0x153   :  { %3235 = vmatprep.subr.bf16.mxu0 %v3799_v12  ;;  %3257 = vmatprep.subr.bf16.mxu1 %v3801_v14  ;;  %v3861_v11 = vld [vmem:[#allocation8 + $0x38] sm:$0xff]   ;;  %v426_v14 = vlaneseq }
 0x154   :  { %v3862_v12 = vld [vmem:[#allocation8 + $0xb8] sm:$0xff]  }
 0x156   :  { %3236 = vmatpush3.bf16.msra.mxu0 %v3800_v16  ;;  %3258 = vmatpush3.bf16.msra.mxu1 %v3802_v17  ;;  %v427_v16 = vshrl.u32 %v426_v14, 7 }
 0x157   :  { %3237 = vmatprep.subr.bf16.mxu0 %v3803_v18  ;;  %3259 = vmatprep.subr.bf16.mxu1 %v3805_v20  ;;  %v424_v20 = vld [vmem:[#allocation7] sm:$0x1f] }
 0x158   :  { %v428_v17 = vsub.s32 0, %v427_v16  ;;  %v436_v18 = vsub.s32 2, %v427_v16 }
 0x15a   :  { %3238 = vmatpush3.bf16.msra.mxu0 %v3804_v21  ;;  %3260 = vmatpush3.bf16.msra.mxu1 %v3806_v22  ;;  %v432_v21 = vsub.s32 1, %v427_v16  ;;  %v440_v22 = vsub.s32 3, %v427_v16 }
 0x15b   :  { %3267 = vmatprep.subr.bf16.mxu0 %v3807_v23  ;;  %3351 = vmatprep.subr.bf16.mxu1 %v4021_v13  ;;  %v429_v23 = vrot.slane %v424_v20, %v428_v17 }
 0x15d   :  { %2293 = vmatmul.mubr.bf16.vlgmr.msra.gmra.mrb[4].mxu0 %v4118_v5  ;;  %2333 = vmatmul.mubr.bf16.vlgmr.msra.gmra.mrb[4].mxu1 %v4132_v9  ;;  %v3815_v5 = vld [vmem:[#allocation5 + $0x7e0] ss:$20 sps:$4 sm:$0xff]   ;;  %v3816_v9 = vld [vmem:[#allocation5 + $0x6c8] ss:$20 sps:$4 sm:$0xff]  }
 0x15e   :  { %3268 = vmatpush3.bf16.msra.mxu0 %v3808_v24  ;;  %3352 = vmatpush3.bf16.msra.mxu1 %v3809_v25  ;;  %v437_v24 = vrot.slane %v424_v20, %v436_v18  ;;  %v433_v25 = vrot.slane %v424_v20, %v432_v21 }
 0x15f   :  { %3269 = vmatprep.subr.bf16.mxu0 %v3810_v26  ;;  %3353 = vmatprep.subr.bf16.mxu1 %v4021_v13  ;;  %v441_v26 = vrot.slane %v424_v20, %v440_v22 }
 0x160   :  { %2372 = vmatprep.mubr.bf16.mxu0 %v4138_v15  ;;  %3367 = vmatprep.mubr.msk.bf16.mxu1 %vm4022_vm0, %v4021_v13  ;;  %v3819_v15 = vld [vmem:[#allocation5 + $0x6f0] ss:$20 sps:$4 sm:$0xff]  }
 0x162   :  { %3270 = vmatpush3.bf16.msra.mxu0 %v3811_v27  ;;  %3354 = vmatpush3.bf16.msra.mxu1 %v3812_v28 }
 0x163   :  { %3271 = vmatprep.subr.bf16.mxu0 %v3813_v29  ;;  %3355 = vmatprep.subr.bf16.mxu1 %v4021_v13 }
 0x166   :  { %3272 = vmatpush3.bf16.msra.mxu0 %v3814_v31  ;;  %3356 = vmatpush3.bf16.msra.mxu1 %v3815_v5 }
 0x167   :  { %3273 = vmatprep.subr.bf16.mxu0 %v3816_v9  ;;  %3357 = vmatprep.subr.bf16.mxu1 %v4021_v13 }
 0x16a   :  { %3274 = vmatpush3.bf16.msra.mxu0 %v3817_v32  ;;  %3358 = vmatpush3.bf16.msra.mxu1 %v3818_v33 }
 0x16b   :  { %3275 = vmatprep.subr.bf16.mxu0 %v3819_v15  ;;  %3359 = vmatprep.subr.bf16.mxu1 %v4021_v13 }
 0x16e   :  { %3276 = vmatpush3.bf16.msra.mxu0 %v3820_v34  ;;  %3360 = vmatpush3.bf16.msra.mxu1 %v3821_v35 }
 0x16f   :  { %3277 = vmatprep.subr.bf16.mxu0 %v3822_v36  ;;  %3361 = vmatprep.subr.bf16.mxu1 %v4021_v13 }
 0x172   :  { %3278 = vmatpush3.bf16.msra.mxu0 %v3823_v37  ;;  %3362 = vmatpush3.bf16.msra.mxu1 %v3824_v38 }
 0x173   :  { %3279 = vmatprep.subr.bf16.mxu0 %v3825_v39  ;;  %3363 = vmatprep.subr.bf16.mxu1 %v4021_v13 }
 0x176   :  { %3280 = vmatpush3.bf16.msra.mxu0 %v3826_v40  ;;  %3364 = vmatpush3.bf16.msra.mxu1 %v3827_v41 }
 0x177   :  { %3281 = vmatprep.subr.bf16.mxu0 %v3828_v42  ;;  %3365 = vmatprep.subr.bf16.mxu1 %v4021_v13 }
 0x17a   :  { %3282 = vmatpush3.bf16.msra.mxu0 %v3829_v43  ;;  %3366 = vmatpush3.bf16.msra.mxu1 %v3830_v44  ;;  %v3863_v43 = vld [vmem:[#allocation8 + $0x100] sm:$0xff]  }
 0x17b   :  { %3298 = vmatprep.subr.bf16.mxu0 %v3831_v45  ;;  %3320 = vmatprep.subr.bf16.mxu1 %v3832_v46  ;;  %v3864_v46 = vld [vmem:[#allocation8 + $0x108] sm:$0xff]  }
 0x17d   :  { %2373 = vmatmul.mubr.bf16.vlgmr.msra.gmra.mrb[8].mxu0 %v4146_v19  ;;  %3368 = vmatmul.mubr.bf16.vlgmr.msra.gmra.mrb[8].mxu1 %v4150_v52  ;;  %v3845_v19 = vld [vmem:[#allocation8 + $0x18] sm:$0xff]  }
 0x17e   :  { %3299 = vmatpush3.bf16.msra.mxu0 %v3833_v47  ;;  %3321 = vmatpush3.bf16.msra.mxu1 %v3834_v49  ;;  %v3846_v52 = vld [vmem:[#allocation8 + $0x98] sm:$0xff]   ;;  %v3865_v47 = vld [vmem:[#allocation8 + $0x110] sm:$0xff]  }
 0x17f   :  { %3300 = vmatprep.subr.bf16.mxu0 %v3835_v50  ;;  %3322 = vmatprep.subr.bf16.mxu1 %v3836_v51  ;;  %v3866_v49 = vld [vmem:[#allocation8 + $0x118] sm:$0xff]   ;;  %v3867_v50 = vld [vmem:[#allocation8 + $0x120] sm:$0xff]   ;;  %v3868_v51 = vld [vmem:[#allocation8 + $0x128] sm:$0xff]  }
 0x182   :  { %3301 = vmatpush3.bf16.msra.mxu0 %v3837_v53  ;;  %3323 = vmatpush3.bf16.msra.mxu1 %v3838_v54  ;;  %v444_v53 = vsub.s32 4, %v427_v16  ;;  %v3869_v54 = vld [vmem:[#allocation8 + $0x130] sm:$0xff]  }
 0x183   :  { %3302 = vmatprep.subr.bf16.mxu0 %v3839_v55  ;;  %3324 = vmatprep.subr.bf16.mxu1 %v3840_v56 }
 0x184   :  { %v445_v56 = vrot.slane %v424_v20, %v444_v53 }
 0x186   :  { %3303 = vmatpush3.bf16.msra.mxu0 %v3841_v57  ;;  %3325 = vmatpush3.bf16.msra.mxu1 %v3842_v58 }
 0x187   :  { %3304 = vmatprep.subr.bf16.mxu0 %v3843_v59  ;;  %3326 = vmatprep.subr.bf16.mxu1 %v3844_v60 }
 0x18a   :  { %3305 = vmatpush3.bf16.msra.mxu0 %v3845_v19  ;;  %3327 = vmatpush3.bf16.msra.mxu1 %v3846_v52 }
 0x18b   :  { %3306 = vmatprep.subr.bf16.mxu0 %v3847_v61  ;;  %3328 = vmatprep.subr.bf16.mxu1 %v3848_v62  ;;  %v3870_v62 = vld [vmem:[#allocation8 + $0x138] sm:$0xff]  }
 0x18e   :  { %3307 = vmatpush3.bf16.msra.mxu0 %v3849_v63  ;;  %3329 = vmatpush3.bf16.msra.mxu1 %v3850_v0 }
 0x18f   :  { %3308 = vmatprep.subr.bf16.mxu0 %v3851_v1  ;;  %3330 = vmatprep.subr.bf16.mxu1 %v3852_v2 }
 0x192   :  { %3309 = vmatpush3.bf16.msra.mxu0 %v3853_v3  ;;  %3331 = vmatpush3.bf16.msra.mxu1 %v3854_v4 }
 0x193   :  { %3310 = vmatprep.subr.bf16.mxu0 %v3855_v6  ;;  %3332 = vmatprep.subr.bf16.mxu1 %v3856_v7 }
 0x196   :  { %3311 = vmatpush3.bf16.msra.mxu0 %v3857_v8  ;;  %3333 = vmatpush3.bf16.msra.mxu1 %v3858_v10 }
 0x197   :  { %3312 = vmatprep.subr.bf16.mxu0 %v3859_v48  ;;  %3334 = vmatprep.subr.bf16.mxu1 %v3860_v30 }
 0x19a   :  { %3313 = vmatpush3.bf16.msra.mxu0 %v3861_v11  ;;  %3335 = vmatpush3.bf16.msra.mxu1 %v3862_v12 }
 0x19b   :  { %3371 = vmatprep.subr.bf16.mxu0 %v4021_v13 }
 0x210   :  { %v2089_v27 = vpop.f32.mrb[0].mxu0  ;;  %v2253_v28 = vpop.f32.mrb[0].mxu1 }
 0x211   :  { %v3391_v29 = vadd.f32 %v2089_v27, %v429_v23  ;;  %v3393_v31 = vadd.f32 %v2253_v28, %v437_v24  ;;  %v2091_v5 = vpop.f32.mrb[1].mxu0  ;;  %v2255_v9 = vpop.f32.mrb[1].mxu1 }
 0x212   :  { %v3392_v32 = vadd.f32 %v2091_v5, %v433_v25  ;;  %v3394_v33 = vadd.f32 %v2255_v9, %v441_v26  ;;  %v2093_v15 = vpop.f32.mrb[2].mxu0  ;;  %v2257_v34 = vpop.f32.mrb[2].mxu1 }
 0x213   :  { %v2420_v35 = vmax.f32 %v3391_v29, 0.0  ;;  %v2422_v36 = vmax.f32 %v3393_v31, 0.0  ;;  %v2094_v37 = vpop.f32.mrb[3].mxu0  ;;  %v2258_v38 = vpop.f32.mrb[3].mxu1 }
 0x214   :  { %v2421_v39 = vmax.f32 %v3392_v32, 0.0  ;;  %v2423_v40 = vmax.f32 %v3394_v33, 0.0 }
 0x215   :  { %v2425_v44 = vpack.c.bf16 %v2420_v35, %v2420_v35  ;;  %v2427_v45 = vpack.c.bf16 %v2422_v36, %v2422_v36 }
 0x216   :  { %v2426_v41 = vpack.c.bf16 %v2421_v39, %v2421_v39  ;;  %v2428_v42 = vpack.c.bf16 %v2423_v40, %v2423_v40 }
 0x218   :  { %2789 = vmatprep.mubr.bf16.mxu0 %v2426_v41  ;;  %2829 = vmatprep.mubr.bf16.mxu1 %v2428_v42 }
 0x219   :  { %2790 = vmatmul.mubr.bf16.vlgmr.msra.gmra.mrb[12].mxu0 %v2425_v44  ;;  %2830 = vmatmul.mubr.bf16.vlgmr.msra.gmra.mrb[12].mxu1 %v2427_v45 }
 0x21a   :  { %3372 = vmatpush3.bf16.msra.mxu0 %v3863_v43  ;;  %3387 = vmatprep.mubr.msk.bf16.mxu0 %vm4022_vm0, %v4021_v13 }
 0x21b   :  { %3373 = vmatprep.subr.bf16.mxu0 %v4021_v13 }
 0x21e   :  { %3374 = vmatpush3.bf16.msra.mxu0 %v3864_v46 }
 0x21f   :  { %3375 = vmatprep.subr.bf16.mxu0 %v4021_v13 }
 0x222   :  { %3376 = vmatpush3.bf16.msra.mxu0 %v3865_v47 }
 0x223   :  { %3377 = vmatprep.subr.bf16.mxu0 %v4021_v13 }
 0x226   :  { %3378 = vmatpush3.bf16.msra.mxu0 %v3866_v49 }
 0x227   :  { %3379 = vmatprep.subr.bf16.mxu0 %v4021_v13 }
 0x22a   :  { %3380 = vmatpush3.bf16.msra.mxu0 %v3867_v50 }
 0x22b   :  { %3381 = vmatprep.subr.bf16.mxu0 %v4021_v13 }
 0x22e   :  { %3382 = vmatpush3.bf16.msra.mxu0 %v3868_v51 }
 0x22f   :  { %3383 = vmatprep.subr.bf16.mxu0 %v4021_v13 }
 0x230   :  { %v3239_v55 = vpop.f32.mrb[4].mxu0  ;;  %v3261_v57 = vpop.f32.mrb[4].mxu1 }
 0x231   :  { %v3240_v58 = vpop.f32.mrb[5].mxu0  ;;  %v3262_v59 = vpop.f32.mrb[5].mxu1 }
 0x232   :  { %v3241_v60 = vadd.f32 %v3240_v58, %v3239_v55  ;;  %v3242_v19 = vpop.f32.mrb[6].mxu0  ;;  %v3263_v52 = vadd.f32 %v3262_v59, %v3261_v57  ;;  %v3264_v61 = vpop.f32.mrb[6].mxu1  ;;  %3384 = vmatpush3.bf16.msra.mxu0 %v3869_v54 }
 0x233   :  { %v3243_v63 = vpop.f32.mrb[7].mxu0  ;;  %v3265_v0 = vpop.f32.mrb[7].mxu1  ;;  %3385 = vmatprep.subr.bf16.mxu0 %v4021_v13  ;;  %v3182_v13 = vld [vmem:[#allocation10] ss:$0 sm:$0xff] }
 0x234   :  { %v2295_v1 = vadd.f32 %v3241_v60, %v445_v56 }
 0x236   :  { %v2335_v2 = vadd.f32 %v3263_v52, %v2295_v1  ;;  %3386 = vmatpush3.bf16.msra.mxu0 %v3870_v62 }
 0x250   :  { %v3283_v3 = vpop.f32.mrb[8].mxu0  ;;  %v2414_v4 = vpop.f32.mrb[8].mxu1 }
 0x251   :  { %v3284_v6 = vpop.f32.mrb[9].mxu0  ;;  %v3369_v7 = vpop.f32.mrb[9].mxu1 }
 0x252   :  { %v3285_v8 = vadd.f32 %v3284_v6, %v3283_v3  ;;  %v3286_v10 = vpop.f32.mrb[10].mxu0  ;;  %v2417_v48 = vpop.f32.mrb[10].mxu1 }
 0x253   :  { %v3287_v30 = vpop.f32.mrb[11].mxu0  ;;  %v3370_v11 = vpop.f32.mrb[11].mxu1 }
 0x254   :  { %v2375_v12 = vadd.f32 %v3285_v8, %v2335_v2 }
 0x256   :  { %v2415_v14 = vadd.f32 %v2414_v4, %v2375_v12 }
 0x258   :  { %v2424_v16 = vmax.f32 %v2415_v14, 0.0 }
 0x25a   :  { %v2429_v17 = vpack.c.bf16 %v2424_v16, %v2424_v16 }
 0x25c   :  { %3388 = vmatmul.mubr.bf16.vlgmr.msra.gmra.mrb[16].mxu0 %v2429_v17 }
 0x2ec   :  { %v3314_v18 = vpop.f32.mrb[12].mxu0  ;;  %v3336_v20 = vpop.f32.mrb[12].mxu1 }
 0x2ed   :  { %v3315_v21 = vpop.f32.mrb[13].mxu0  ;;  %v3337_v22 = vpop.f32.mrb[13].mxu1 }
 0x2ee   :  { %v3316_v23 = vadd.f32 %v3315_v21, %v3314_v18  ;;  %v3338_v24 = vadd.f32 %v3337_v22, %v3336_v20  ;;  %v3317_v25 = vpop.f32.mrb[14].mxu0  ;;  %v3339_v26 = vpop.f32.mrb[14].mxu1 }
 0x2ef   :  { %v3318_v27 = vpop.f32.mrb[15].mxu0  ;;  %v3340_v28 = vpop.f32.mrb[15].mxu1 }
 0x2f0   :  { %v2792_v29 = vadd.f32 %v3316_v23, %v3182_v13 }
 0x2f2   :  { %v2832_v31 = vadd.f32 %v3338_v24, %v2792_v29 }
 0x32f   :  { %v2871_v5 = vpop.f32.mrb[16].mxu0 }
 0x330   :  { %v2872_v9 = vadd.f32 %v2871_v5, %v2832_v31  ;;  %v3389_v32 = vpop.f32.mrb[17].mxu0 }
 0x331   :  { %v2874_v33 = vpop.f32.mrb[18].mxu0 }
 0x332   :  { %2877 = vst [vmem:[#allocation11] sm:$0xff] %v2872_v9  ;;  %v3390_v15 = vpop.f32.mrb[19].mxu0 }
 0x333   :  { %3992 = shalt.err (!%p3989_p2)
}
 0x334   :  { %s3993_s7 = scalar_lea.hbm %s4198_s5, 128 }
 0x335   :  { %p3994_p3 = scmp.ne.s32.totalorder %s4198_s5, %s3993_s7  ;;  %p3997_p4 = scmp.lt.u32.totalorder %s3993_s7, %s4198_s5 }
 0x337   :  { %p3999_p5 = pnand %p3997_p4, %p3994_p3 }
 0x339   :  { %4002 = shalt.err (!%p3999_p5)
}
 0x33a   :  { %2887 = dma.vmem_to_hbm [thread:$0]  %s2885_s29, 128, %s4198_s5, [#allocation4]  }
 0x33b   :  { %4009 = dma.done.wait [#allocation4], 128  }
 0x33c   :  { %4010 = vsyncadd [#allocation4], 4294967168 }
 0x33d   :  { %2891 = vsyncpa [#allocation3], 1 }
 0x33e   :  { %2892 = vsyncpa [#allocation6], 1 }
 0x33f   :  { %2893 = vsyncpa [#allocation9], 1 }
 0x340   :  { %2894 = vsyncpa [#allocation4], 1 }

</bundles_post_ra>
